<compile_context>
chip_gen: v5e
topology: v5e:2x2
jax: 0.10.0
libtpu: 0.0.40
codegen_flags: <defaults>
</compile_context>

<pallas_src>
import functools

import jax
import jax.numpy as jnp
from jax.experimental import pallas as pl
from jax.experimental.pallas import tpu as pltpu


def _lane_shift_pair(x, d, axis):
    """Return (x[l + d], x[l - d]) cyclically along `axis` (static d).

    Built from pltpu.roll in a way that is independent of the roll shift-sign
    convention: an iota probe decides which of the two rolls is the "+d" one.
    Pure data movement (XLU), exact in f32.
    """
    n = x.shape[axis]
    d = d % n
    if d == 0:
        return x, x
    lane = jax.lax.broadcasted_iota(jnp.int32, x.shape, axis)
    r_a = pltpu.roll(x, d, axis)
    r_b = pltpu.roll(x, n - d, axis)
    probe = pltpu.roll(lane, d, axis)
    a_is_plus = probe == (lane + d) % n
    plus = jnp.where(a_is_plus, r_a, r_b)
    minus = jnp.where(a_is_plus, r_b, r_a)
    return plus, minus


def _group_mean_lanes(x, group, axis):
    """Exact f32 mean over aligned `group`-lane windows along `axis`,
    replicated to every lane of its window (butterfly all-reduce).

    `group` must be a power of two dividing x.shape[axis].  All lanes of a
    window end up with bitwise-identical values, so the gate derived from it
    is exactly constant across V, matching the reference broadcast semantics.
    """
    lane = jax.lax.broadcasted_iota(jnp.int32, x.shape, axis)
    acc = x
    d = 1
    while d < group:
        plus, minus = _lane_shift_pair(acc, d, axis)
        partner = jnp.where(lane % (2 * d) < d, plus, minus)  # acc[l XOR d]
        acc = acc + partner
        d *= 2
    return acc * (1.0 / group)


def _tme_kernel(V, x_ref, w1_ref, w3_ref, pcr_ref, pc_ref, out_ref):
    """x_ref block: (Nb, C, T*V) with the fused trailing axis lane-dense."""
    x = x_ref[...]                                    # (Nb, C, TV) f32
    TV = x.shape[2]
    T = TV // V

    # Mean over V (hoisted ahead of the linear, per-channel conv1/bn1/conv2),
    # replicated across each V-lane group.
    xm = _group_mean_lanes(x, V, axis=2)              # (Nb, C, TV)

    # conv1 (1x1, C -> Cr) with the bn1 scale folded in, plus the bn1 shift.
    # Contraction over C is done on the VPU (exact f32, no MXU needed at
    # these channel counts).
    w1 = w1_ref[...]                                  # (Cr, C, 1)  s1-folded
    b1 = pcr_ref[0]                                   # (Cr, 1)
    bm = jnp.sum(xm[:, None, :, :] * w1[None, :, :, :], axis=2)   # (Nb, Cr, TV)
    bm = bm + b1[None, :, :]

    # Temporal difference: diff[t] = w2*bm[t+1] - bm[t] for t < T-1, 0 at T-1.
    # (Mixing the depthwise-scaled t+1 term with the unscaled t term is
    #  intentional -- it matches the reference module.)
    w2 = pcr_ref[1]                                   # (Cr, 1)
    bm_next, _ = _lane_shift_pair(bm, V, 2)           # value of the next t-group
    lane = jax.lax.broadcasted_iota(jnp.int32, bm.shape, 2)
    diff = jnp.where(lane < (T - 1) * V, w2[None, :, :] * bm_next - bm, 0.0)

    # conv3 (1x1, Cr -> C) with the bn3 scale folded in, bn3 shift, sigmoid.
    w3 = w3_ref[...]                                  # (C, Cr, 1)  s3-folded
    b3 = pc_ref[0]                                    # (C, 1)
    z = jnp.sum(diff[:, None, :, :] * w3[None, :, :, :], axis=2)  # (Nb, C, TV)
    z = z + b3[None, :, :]
    gate = jax.nn.sigmoid(z)                          # constant across each V group

    # out = x + x * gate   (full 128-lane, unmasked stores)
    out_ref[...] = (x * (1.0 + gate)).astype(out_ref.dtype)


def _pick_block_batch(n, bytes_per_sample, budget_bytes):
    """Largest divisor of n whose x-block fits the VMEM budget, preferring to
    keep >= 2 grid steps so both v7x TensorCores get work."""
    cap = max(1, budget_bytes // max(1, bytes_per_sample))
    divs = [d for d in range(1, n + 1) if n % d == 0 and d <= cap]
    if not divs:
        return 1
    pref = [d for d in divs if n // d >= 2]
    return max(pref) if pref else max(divs)


@functools.partial(jax.jit, static_argnames=("block_budget_bytes",))
def tme_forward(x_nctv, params, block_budget_bytes=512 * 1024):
    """x_nctv: (N, C, T, V) float32 -> (N, C, T, V)."""
    N, C, T, V = x_nctv.shape
    TV = T * V
    assert V > 0 and (V & (V - 1)) == 0, "V must be a power of two"

    # Free reshape: fuse the two contiguous minor dims into one lane-dense axis.
    x3 = x_nctv.reshape(N, C, TV)

    nb = _pick_block_batch(N, C * TV * x3.dtype.itemsize, block_budget_bytes)
    grid = (N // nb,)

    out3 = pl.pallas_call(
        functools.partial(_tme_kernel, V),
        out_shape=jax.ShapeDtypeStruct((N, C, TV), x3.dtype),
        grid_spec=pltpu.PrefetchScalarGridSpec(
            num_scalar_prefetch=0,
            grid=grid,
            in_specs=[
                pl.BlockSpec((nb, C, TV), lambda n: (n, 0, 0)),           # x
                pl.BlockSpec(params['w1'].shape, lambda n: (0, 0, 0)),    # conv1*s1
                pl.BlockSpec(params['w3'].shape, lambda n: (0, 0, 0)),    # conv3*s3
                pl.BlockSpec(params['p_cr'].shape, lambda n: (0, 0, 0)),  # [b1; w2]
                pl.BlockSpec(params['p_c'].shape, lambda n: (0, 0, 0)),   # [b3]
            ],
            out_specs=pl.BlockSpec((nb, C, TV), lambda n: (n, 0, 0)),
        ),
        # Blocks are sized well under the default scoped-VMEM limit on every
        # generation (v5e 16 MiB default, v7x 64 MiB physical), so no
        # vmem_limit_bytes override is needed.
        compiler_params=pltpu.CompilerParams(
            dimension_semantics=("parallel",)),
    )(x3, params['w1'], params['w3'], params['p_cr'], params['p_c'])

    return out3.reshape(N, C, T, V)


def make_tme_params(W1, w2, W3, g1, be1, m1, v1, g3, be3, m3, v3, eps=1e-5):
    """Fold inference-mode BN into the 1x1 conv weights and pack the small
    per-channel vectors into two operands (shaped so the channel axis lands on
    sublanes inside the kernel -- no in-kernel transposes needed)."""
    Cr, C = W1.shape
    s1 = g1 / jnp.sqrt(v1 + eps)
    b1 = be1 - m1 * s1
    s3 = g3 / jnp.sqrt(v3 + eps)
    b3 = be3 - m3 * s3
    return dict(
        w1=(W1 * s1[:, None]).reshape(Cr, C, 1),
        w3=(W3 * s3[:, None]).reshape(C, Cr, 1),
        p_cr=jnp.stack([b1, w2], axis=0).reshape(2, Cr, 1),
        p_c=b3.reshape(1, C, 1),
    )


def tme_reference(x, W1, w2, W3, g1, be1, m1, v1, g3, be3, m3, v3, eps=1e-5):
    """Pure-JAX reference matching the PyTorch TME forward (inference BN)."""
    hp = jax.lax.Precision.HIGHEST
    b = jnp.einsum('nctv,kc->nktv', x, W1, precision=hp)
    b = (b - m1[None, :, None, None]) / jnp.sqrt(v1 + eps)[None, :, None, None]
    b = b * g1[None, :, None, None] + be1[None, :, None, None]
    cb = b * w2[None, :, None, None]
    diff = cb[:, :, 1:, :] - b[:, :, :-1, :]
    diff = jnp.pad(diff, ((0, 0), (0, 0), (0, 1), (0, 0)))
    y = jnp.mean(diff, axis=3, keepdims=True)                  # (N, Cr, T, 1)
    z = jnp.einsum('nktv,ck->nctv', y, W3, precision=hp)
    z = (z - m3[None, :, None, None]) / jnp.sqrt(v3 + eps)[None, :, None, None]
    z = z * g3[None, :, None, None] + be3[None, :, None, None]
    s = jax.nn.sigmoid(z)                                      # (N, C, T, 1)
    return x + x * s


if __name__ == "__main__":
    N, C, T, V = 2, 16, 8, 16          # T * V = 128 -> lane-dense fused axis
    reduction = 4
    Cr = C // reduction
    eps = 1e-5

    key = jax.random.PRNGKey(0)
    ks = jax.random.split(key, 12)

    x = jax.random.normal(ks[0], (N, C, T, V), dtype=jnp.float32)

    # Deterministic synthetic parameters (not a checkpoint load).
    W1 = jax.random.normal(ks[1], (Cr, C), dtype=jnp.float32) * 0.3   # conv1 1x1
    w2 = jax.random.normal(ks[2], (Cr,),   dtype=jnp.float32) * 0.3   # conv2 depthwise 1x1
    W3 = jax.random.normal(ks[3], (C, Cr), dtype=jnp.float32) * 0.3   # conv3 1x1
    g1  = 1.0 + 0.1 * jax.random.normal(ks[4], (Cr,), dtype=jnp.float32)
    be1 = 0.1 * jax.random.normal(ks[5], (Cr,), dtype=jnp.float32)
    m1  = 0.1 * jax.random.normal(ks[6], (Cr,), dtype=jnp.float32)
    v1  = 0.5 + jnp.abs(jax.random.normal(ks[7], (Cr,), dtype=jnp.float32))
    g3  = 1.0 + 0.1 * jax.random.normal(ks[8], (C,), dtype=jnp.float32)
    be3 = 0.1 * jax.random.normal(ks[9], (C,), dtype=jnp.float32)
    m3  = 0.1 * jax.random.normal(ks[10], (C,), dtype=jnp.float32)
    v3  = 0.5 + jnp.abs(jax.random.normal(ks[11], (C,), dtype=jnp.float32))

    params = make_tme_params(W1, w2, W3, g1, be1, m1, v1, g3, be3, m3, v3, eps)

    out = jax.block_until_ready(tme_forward(x, params))

    ref = tme_reference(x, W1, w2, W3, g1, be1, m1, v1, g3, be3, m3, v3, eps)
    assert out.shape == (N, C, T, V)
    err = jnp.max(jnp.abs(out - ref))
    assert jnp.allclose(out, ref, atol=1e-5, rtol=1e-5), f"max abs err {err}"

    print("KERNEL_OK")
</pallas_src>

<mosaic_0001>
module attributes {stable_mosaic.version = 11 : i64} {
  func.func @_tme_kernel(%arg0: i32, %arg1: memref<1x16x128xf32, #tpu.memory_space<vmem>>, %arg2: memref<4x16x1xf32, #tpu.memory_space<vmem>>, %arg3: memref<16x4x1xf32, #tpu.memory_space<vmem>>, %arg4: memref<2x4x1xf32, #tpu.memory_space<vmem>>, %arg5: memref<1x16x1xf32, #tpu.memory_space<vmem>>, %arg6: memref<1x16x128xf32, #tpu.memory_space<vmem>>) attributes {dimension_semantics = [#tpu.dimension_semantics<parallel>], iteration_bounds = array<i64: 2>, scalar_prefetch = 0 : i64, scratch_operands = 0 : i64, tpu.core_type = #tpu.core_type<tc>, window_params = [{transform_indices = @transform_0, window_bounds = array<i64: 1, 16, 128>}, {pipeline_mode = #tpu.pipeline_mode<synchronous>, transform_indices = @transform_1, window_bounds = array<i64: 4, 16, 1>}, {pipeline_mode = #tpu.pipeline_mode<synchronous>, transform_indices = @transform_2, window_bounds = array<i64: 16, 4, 1>}, {pipeline_mode = #tpu.pipeline_mode<synchronous>, transform_indices = @transform_3, window_bounds = array<i64: 2, 4, 1>}, {pipeline_mode = #tpu.pipeline_mode<synchronous>, transform_indices = @transform_4, window_bounds = array<i64: 1, 16, 1>}, {transform_indices = @transform_5, window_bounds = array<i64: 1, 16, 128>}]} {
    %c0 = arith.constant 0 : index
    %c0_0 = arith.constant 0 : index
    %c0_1 = arith.constant 0 : index
    %0 = vector.load %arg1[%c0, %c0_0, %c0_1] : memref<1x16x128xf32, #tpu.memory_space<vmem>>, vector<1x16x128xf32>
    %1 = tpu.iota {dimensions = array<i32: 2>} : vector<1x16x128xi32>
    %2 = tpu.iota {dimensions = array<i32: 2>} : vector<1x16x128xi32>
    %c1_i32 = arith.constant 1 : i32
    %3 = tpu.dynamic_rotate %0 by %c1_i32 dim 2 : vector<1x16x128xf32>, i32 -> vector<1x16x128xf32>
    %c127_i32 = arith.constant 127 : i32
    %4 = tpu.dynamic_rotate %0 by %c127_i32 dim 2 : vector<1x16x128xf32>, i32 -> vector<1x16x128xf32>
    %c1_i32_2 = arith.constant 1 : i32
    %5 = tpu.dynamic_rotate %2 by %c1_i32_2 dim 2 : vector<1x16x128xi32>, i32 -> vector<1x16x128xi32>
    %c1_i32_3 = arith.constant 1 : i32
    %6 = vector.broadcast %c1_i32_3 : i32 to vector<1x16x128xi32>
    %7 = arith.addi %2, %6 : vector<1x16x128xi32>
    %c128_i32 = arith.constant 128 : i32
    %c0_i32 = arith.constant 0 : i32
    %8 = arith.cmpi eq, %c128_i32, %c0_i32 : i32
    %c1_i32_4 = arith.constant 1 : i32
    %9 = arith.select %8, %c1_i32_4, %c128_i32 : i32
    %10 = vector.broadcast %9 : i32 to vector<1x16x128xi32>
    %11 = arith.remsi %7, %10 : vector<1x16x128xi32>
    %c0_i32_5 = arith.constant 0 : i32
    %12 = vector.broadcast %c0_i32_5 : i32 to vector<1x16x128xi32>
    %13 = arith.cmpi ne, %11, %12 : vector<1x16x128xi32>
    %c0_i32_6 = arith.constant 0 : i32
    %14 = vector.broadcast %c0_i32_6 : i32 to vector<1x16x128xi32>
    %15 = arith.cmpi slt, %11, %14 : vector<1x16x128xi32>
    %c0_i32_7 = arith.constant 0 : i32
    %16 = arith.cmpi slt, %9, %c0_i32_7 : i32
    %17 = vector.broadcast %16 : i1 to vector<1x16x128xi1>
    %18 = vector.broadcast %17 : vector<1x16x128xi1> to vector<1x16x128xi1>
    %19 = arith.xori %15, %18 : vector<1x16x128xi1>
    %20 = arith.andi %19, %13 : vector<1x16x128xi1>
    %21 = vector.broadcast %9 : i32 to vector<1x16x128xi32>
    %22 = arith.addi %11, %21 : vector<1x16x128xi32>
    %23 = arith.select %20, %22, %11 : vector<1x16x128xi1>, vector<1x16x128xi32>
    %24 = arith.cmpi eq, %5, %23 : vector<1x16x128xi32>
    %25 = arith.select %24, %3, %4 : vector<1x16x128xi1>, vector<1x16x128xf32>
    %26 = arith.select %24, %4, %3 : vector<1x16x128xi1>, vector<1x16x128xf32>
    %c2_i32 = arith.constant 2 : i32
    %c0_i32_8 = arith.constant 0 : i32
    %27 = arith.cmpi eq, %c2_i32, %c0_i32_8 : i32
    %c1_i32_9 = arith.constant 1 : i32
    %28 = arith.select %27, %c1_i32_9, %c2_i32 : i32
    %29 = vector.broadcast %28 : i32 to vector<1x16x128xi32>
    %30 = arith.remsi %1, %29 : vector<1x16x128xi32>
    %c0_i32_10 = arith.constant 0 : i32
    %31 = vector.broadcast %c0_i32_10 : i32 to vector<1x16x128xi32>
    %32 = arith.cmpi ne, %30, %31 : vector<1x16x128xi32>
    %c0_i32_11 = arith.constant 0 : i32
    %33 = vector.broadcast %c0_i32_11 : i32 to vector<1x16x128xi32>
    %34 = arith.cmpi slt, %30, %33 : vector<1x16x128xi32>
    %c0_i32_12 = arith.constant 0 : i32
    %35 = arith.cmpi slt, %28, %c0_i32_12 : i32
    %36 = vector.broadcast %35 : i1 to vector<1x16x128xi1>
    %37 = vector.broadcast %36 : vector<1x16x128xi1> to vector<1x16x128xi1>
    %38 = arith.xori %34, %37 : vector<1x16x128xi1>
    %39 = arith.andi %38, %32 : vector<1x16x128xi1>
    %40 = vector.broadcast %28 : i32 to vector<1x16x128xi32>
    %41 = arith.addi %30, %40 : vector<1x16x128xi32>
    %42 = arith.select %39, %41, %30 : vector<1x16x128xi1>, vector<1x16x128xi32>
    %c1_i32_13 = arith.constant 1 : i32
    %43 = vector.broadcast %c1_i32_13 : i32 to vector<1x16x128xi32>
    %44 = arith.cmpi slt, %42, %43 : vector<1x16x128xi32>
    %45 = arith.select %44, %25, %26 : vector<1x16x128xi1>, vector<1x16x128xf32>
    %46 = arith.addf %0, %45 : vector<1x16x128xf32>
    %47 = tpu.iota {dimensions = array<i32: 2>} : vector<1x16x128xi32>
    %c2_i32_14 = arith.constant 2 : i32
    %48 = tpu.dynamic_rotate %46 by %c2_i32_14 dim 2 : vector<1x16x128xf32>, i32 -> vector<1x16x128xf32>
    %c126_i32 = arith.constant 126 : i32
    %49 = tpu.dynamic_rotate %46 by %c126_i32 dim 2 : vector<1x16x128xf32>, i32 -> vector<1x16x128xf32>
    %c2_i32_15 = arith.constant 2 : i32
    %50 = tpu.dynamic_rotate %47 by %c2_i32_15 dim 2 : vector<1x16x128xi32>, i32 -> vector<1x16x128xi32>
    %c2_i32_16 = arith.constant 2 : i32
    %51 = vector.broadcast %c2_i32_16 : i32 to vector<1x16x128xi32>
    %52 = arith.addi %47, %51 : vector<1x16x128xi32>
    %c128_i32_17 = arith.constant 128 : i32
    %c0_i32_18 = arith.constant 0 : i32
    %53 = arith.cmpi eq, %c128_i32_17, %c0_i32_18 : i32
    %c1_i32_19 = arith.constant 1 : i32
    %54 = arith.select %53, %c1_i32_19, %c128_i32_17 : i32
    %55 = vector.broadcast %54 : i32 to vector<1x16x128xi32>
    %56 = arith.remsi %52, %55 : vector<1x16x128xi32>
    %c0_i32_20 = arith.constant 0 : i32
    %57 = vector.broadcast %c0_i32_20 : i32 to vector<1x16x128xi32>
    %58 = arith.cmpi ne, %56, %57 : vector<1x16x128xi32>
    %c0_i32_21 = arith.constant 0 : i32
    %59 = vector.broadcast %c0_i32_21 : i32 to vector<1x16x128xi32>
    %60 = arith.cmpi slt, %56, %59 : vector<1x16x128xi32>
    %c0_i32_22 = arith.constant 0 : i32
    %61 = arith.cmpi slt, %54, %c0_i32_22 : i32
    %62 = vector.broadcast %61 : i1 to vector<1x16x128xi1>
    %63 = vector.broadcast %62 : vector<1x16x128xi1> to vector<1x16x128xi1>
    %64 = arith.xori %60, %63 : vector<1x16x128xi1>
    %65 = arith.andi %64, %58 : vector<1x16x128xi1>
    %66 = vector.broadcast %54 : i32 to vector<1x16x128xi32>
    %67 = arith.addi %56, %66 : vector<1x16x128xi32>
    %68 = arith.select %65, %67, %56 : vector<1x16x128xi1>, vector<1x16x128xi32>
    %69 = arith.cmpi eq, %50, %68 : vector<1x16x128xi32>
    %70 = arith.select %69, %48, %49 : vector<1x16x128xi1>, vector<1x16x128xf32>
    %71 = arith.select %69, %49, %48 : vector<1x16x128xi1>, vector<1x16x128xf32>
    %c4_i32 = arith.constant 4 : i32
    %c0_i32_23 = arith.constant 0 : i32
    %72 = arith.cmpi eq, %c4_i32, %c0_i32_23 : i32
    %c1_i32_24 = arith.constant 1 : i32
    %73 = arith.select %72, %c1_i32_24, %c4_i32 : i32
    %74 = vector.broadcast %73 : i32 to vector<1x16x128xi32>
    %75 = arith.remsi %1, %74 : vector<1x16x128xi32>
    %c0_i32_25 = arith.constant 0 : i32
    %76 = vector.broadcast %c0_i32_25 : i32 to vector<1x16x128xi32>
    %77 = arith.cmpi ne, %75, %76 : vector<1x16x128xi32>
    %c0_i32_26 = arith.constant 0 : i32
    %78 = vector.broadcast %c0_i32_26 : i32 to vector<1x16x128xi32>
    %79 = arith.cmpi slt, %75, %78 : vector<1x16x128xi32>
    %c0_i32_27 = arith.constant 0 : i32
    %80 = arith.cmpi slt, %73, %c0_i32_27 : i32
    %81 = vector.broadcast %80 : i1 to vector<1x16x128xi1>
    %82 = vector.broadcast %81 : vector<1x16x128xi1> to vector<1x16x128xi1>
    %83 = arith.xori %79, %82 : vector<1x16x128xi1>
    %84 = arith.andi %83, %77 : vector<1x16x128xi1>
    %85 = vector.broadcast %73 : i32 to vector<1x16x128xi32>
    %86 = arith.addi %75, %85 : vector<1x16x128xi32>
    %87 = arith.select %84, %86, %75 : vector<1x16x128xi1>, vector<1x16x128xi32>
    %c2_i32_28 = arith.constant 2 : i32
    %88 = vector.broadcast %c2_i32_28 : i32 to vector<1x16x128xi32>
    %89 = arith.cmpi slt, %87, %88 : vector<1x16x128xi32>
    %90 = arith.select %89, %70, %71 : vector<1x16x128xi1>, vector<1x16x128xf32>
    %91 = arith.addf %46, %90 : vector<1x16x128xf32>
    %92 = tpu.iota {dimensions = array<i32: 2>} : vector<1x16x128xi32>
    %c4_i32_29 = arith.constant 4 : i32
    %93 = tpu.dynamic_rotate %91 by %c4_i32_29 dim 2 : vector<1x16x128xf32>, i32 -> vector<1x16x128xf32>
    %c124_i32 = arith.constant 124 : i32
    %94 = tpu.dynamic_rotate %91 by %c124_i32 dim 2 : vector<1x16x128xf32>, i32 -> vector<1x16x128xf32>
    %c4_i32_30 = arith.constant 4 : i32
    %95 = tpu.dynamic_rotate %92 by %c4_i32_30 dim 2 : vector<1x16x128xi32>, i32 -> vector<1x16x128xi32>
    %c4_i32_31 = arith.constant 4 : i32
    %96 = vector.broadcast %c4_i32_31 : i32 to vector<1x16x128xi32>
    %97 = arith.addi %92, %96 : vector<1x16x128xi32>
    %c128_i32_32 = arith.constant 128 : i32
    %c0_i32_33 = arith.constant 0 : i32
    %98 = arith.cmpi eq, %c128_i32_32, %c0_i32_33 : i32
    %c1_i32_34 = arith.constant 1 : i32
    %99 = arith.select %98, %c1_i32_34, %c128_i32_32 : i32
    %100 = vector.broadcast %99 : i32 to vector<1x16x128xi32>
    %101 = arith.remsi %97, %100 : vector<1x16x128xi32>
    %c0_i32_35 = arith.constant 0 : i32
    %102 = vector.broadcast %c0_i32_35 : i32 to vector<1x16x128xi32>
    %103 = arith.cmpi ne, %101, %102 : vector<1x16x128xi32>
    %c0_i32_36 = arith.constant 0 : i32
    %104 = vector.broadcast %c0_i32_36 : i32 to vector<1x16x128xi32>
    %105 = arith.cmpi slt, %101, %104 : vector<1x16x128xi32>
    %c0_i32_37 = arith.constant 0 : i32
    %106 = arith.cmpi slt, %99, %c0_i32_37 : i32
    %107 = vector.broadcast %106 : i1 to vector<1x16x128xi1>
    %108 = vector.broadcast %107 : vector<1x16x128xi1> to vector<1x16x128xi1>
    %109 = arith.xori %105, %108 : vector<1x16x128xi1>
    %110 = arith.andi %109, %103 : vector<1x16x128xi1>
    %111 = vector.broadcast %99 : i32 to vector<1x16x128xi32>
    %112 = arith.addi %101, %111 : vector<1x16x128xi32>
    %113 = arith.select %110, %112, %101 : vector<1x16x128xi1>, vector<1x16x128xi32>
    %114 = arith.cmpi eq, %95, %113 : vector<1x16x128xi32>
    %115 = arith.select %114, %93, %94 : vector<1x16x128xi1>, vector<1x16x128xf32>
    %116 = arith.select %114, %94, %93 : vector<1x16x128xi1>, vector<1x16x128xf32>
    %c8_i32 = arith.constant 8 : i32
    %c0_i32_38 = arith.constant 0 : i32
    %117 = arith.cmpi eq, %c8_i32, %c0_i32_38 : i32
    %c1_i32_39 = arith.constant 1 : i32
    %118 = arith.select %117, %c1_i32_39, %c8_i32 : i32
    %119 = vector.broadcast %118 : i32 to vector<1x16x128xi32>
    %120 = arith.remsi %1, %119 : vector<1x16x128xi32>
    %c0_i32_40 = arith.constant 0 : i32
    %121 = vector.broadcast %c0_i32_40 : i32 to vector<1x16x128xi32>
    %122 = arith.cmpi ne, %120, %121 : vector<1x16x128xi32>
    %c0_i32_41 = arith.constant 0 : i32
    %123 = vector.broadcast %c0_i32_41 : i32 to vector<1x16x128xi32>
    %124 = arith.cmpi slt, %120, %123 : vector<1x16x128xi32>
    %c0_i32_42 = arith.constant 0 : i32
    %125 = arith.cmpi slt, %118, %c0_i32_42 : i32
    %126 = vector.broadcast %125 : i1 to vector<1x16x128xi1>
    %127 = vector.broadcast %126 : vector<1x16x128xi1> to vector<1x16x128xi1>
    %128 = arith.xori %124, %127 : vector<1x16x128xi1>
    %129 = arith.andi %128, %122 : vector<1x16x128xi1>
    %130 = vector.broadcast %118 : i32 to vector<1x16x128xi32>
    %131 = arith.addi %120, %130 : vector<1x16x128xi32>
    %132 = arith.select %129, %131, %120 : vector<1x16x128xi1>, vector<1x16x128xi32>
    %c4_i32_43 = arith.constant 4 : i32
    %133 = vector.broadcast %c4_i32_43 : i32 to vector<1x16x128xi32>
    %134 = arith.cmpi slt, %132, %133 : vector<1x16x128xi32>
    %135 = arith.select %134, %115, %116 : vector<1x16x128xi1>, vector<1x16x128xf32>
    %136 = arith.addf %91, %135 : vector<1x16x128xf32>
    %137 = tpu.iota {dimensions = array<i32: 2>} : vector<1x16x128xi32>
    %c8_i32_44 = arith.constant 8 : i32
    %138 = tpu.dynamic_rotate %136 by %c8_i32_44 dim 2 : vector<1x16x128xf32>, i32 -> vector<1x16x128xf32>
    %c120_i32 = arith.constant 120 : i32
    %139 = tpu.dynamic_rotate %136 by %c120_i32 dim 2 : vector<1x16x128xf32>, i32 -> vector<1x16x128xf32>
    %c8_i32_45 = arith.constant 8 : i32
    %140 = tpu.dynamic_rotate %137 by %c8_i32_45 dim 2 : vector<1x16x128xi32>, i32 -> vector<1x16x128xi32>
    %c8_i32_46 = arith.constant 8 : i32
    %141 = vector.broadcast %c8_i32_46 : i32 to vector<1x16x128xi32>
    %142 = arith.addi %137, %141 : vector<1x16x128xi32>
    %c128_i32_47 = arith.constant 128 : i32
    %c0_i32_48 = arith.constant 0 : i32
    %143 = arith.cmpi eq, %c128_i32_47, %c0_i32_48 : i32
    %c1_i32_49 = arith.constant 1 : i32
    %144 = arith.select %143, %c1_i32_49, %c128_i32_47 : i32
    %145 = vector.broadcast %144 : i32 to vector<1x16x128xi32>
    %146 = arith.remsi %142, %145 : vector<1x16x128xi32>
    %c0_i32_50 = arith.constant 0 : i32
    %147 = vector.broadcast %c0_i32_50 : i32 to vector<1x16x128xi32>
    %148 = arith.cmpi ne, %146, %147 : vector<1x16x128xi32>
    %c0_i32_51 = arith.constant 0 : i32
    %149 = vector.broadcast %c0_i32_51 : i32 to vector<1x16x128xi32>
    %150 = arith.cmpi slt, %146, %149 : vector<1x16x128xi32>
    %c0_i32_52 = arith.constant 0 : i32
    %151 = arith.cmpi slt, %144, %c0_i32_52 : i32
    %152 = vector.broadcast %151 : i1 to vector<1x16x128xi1>
    %153 = vector.broadcast %152 : vector<1x16x128xi1> to vector<1x16x128xi1>
    %154 = arith.xori %150, %153 : vector<1x16x128xi1>
    %155 = arith.andi %154, %148 : vector<1x16x128xi1>
    %156 = vector.broadcast %144 : i32 to vector<1x16x128xi32>
    %157 = arith.addi %146, %156 : vector<1x16x128xi32>
    %158 = arith.select %155, %157, %146 : vector<1x16x128xi1>, vector<1x16x128xi32>
    %159 = arith.cmpi eq, %140, %158 : vector<1x16x128xi32>
    %160 = arith.select %159, %138, %139 : vector<1x16x128xi1>, vector<1x16x128xf32>
    %161 = arith.select %159, %139, %138 : vector<1x16x128xi1>, vector<1x16x128xf32>
    %c16_i32 = arith.constant 16 : i32
    %c0_i32_53 = arith.constant 0 : i32
    %162 = arith.cmpi eq, %c16_i32, %c0_i32_53 : i32
    %c1_i32_54 = arith.constant 1 : i32
    %163 = arith.select %162, %c1_i32_54, %c16_i32 : i32
    %164 = vector.broadcast %163 : i32 to vector<1x16x128xi32>
    %165 = arith.remsi %1, %164 : vector<1x16x128xi32>
    %c0_i32_55 = arith.constant 0 : i32
    %166 = vector.broadcast %c0_i32_55 : i32 to vector<1x16x128xi32>
    %167 = arith.cmpi ne, %165, %166 : vector<1x16x128xi32>
    %c0_i32_56 = arith.constant 0 : i32
    %168 = vector.broadcast %c0_i32_56 : i32 to vector<1x16x128xi32>
    %169 = arith.cmpi slt, %165, %168 : vector<1x16x128xi32>
    %c0_i32_57 = arith.constant 0 : i32
    %170 = arith.cmpi slt, %163, %c0_i32_57 : i32
    %171 = vector.broadcast %170 : i1 to vector<1x16x128xi1>
    %172 = vector.broadcast %171 : vector<1x16x128xi1> to vector<1x16x128xi1>
    %173 = arith.xori %169, %172 : vector<1x16x128xi1>
    %174 = arith.andi %173, %167 : vector<1x16x128xi1>
    %175 = vector.broadcast %163 : i32 to vector<1x16x128xi32>
    %176 = arith.addi %165, %175 : vector<1x16x128xi32>
    %177 = arith.select %174, %176, %165 : vector<1x16x128xi1>, vector<1x16x128xi32>
    %c8_i32_58 = arith.constant 8 : i32
    %178 = vector.broadcast %c8_i32_58 : i32 to vector<1x16x128xi32>
    %179 = arith.cmpi slt, %177, %178 : vector<1x16x128xi32>
    %180 = arith.select %179, %160, %161 : vector<1x16x128xi1>, vector<1x16x128xf32>
    %181 = arith.addf %136, %180 : vector<1x16x128xf32>
    %cst = arith.constant 6.250000e-02 : f32
    %182 = vector.broadcast %cst : f32 to vector<1x16x128xf32>
    %183 = arith.mulf %181, %182 : vector<1x16x128xf32>
    %c0_59 = arith.constant 0 : index
    %c0_60 = arith.constant 0 : index
    %c0_61 = arith.constant 0 : index
    %184 = vector.load %arg2[%c0_59, %c0_60, %c0_61] : memref<4x16x1xf32, #tpu.memory_space<vmem>>, vector<4x16x1xf32>
    %c0_62 = arith.constant 0 : index
    %c0_63 = arith.constant 0 : index
    %c0_64 = arith.constant 0 : index
    %185 = vector.load %arg4[%c0_62, %c0_63, %c0_64] : memref<2x4x1xf32, #tpu.memory_space<vmem>>, vector<1x4x1xf32>
    %186 = vector.shape_cast %185 : vector<1x4x1xf32> to vector<4x1xf32>
    %187 = vector.shape_cast %183 : vector<1x16x128xf32> to vector<1x1x16x128xf32>
    %188 = vector.shape_cast %184 : vector<4x16x1xf32> to vector<1x4x16x1xf32>
    %189 = vector.broadcast %187 : vector<1x1x16x128xf32> to vector<1x4x16x128xf32>
    %190 = vector.broadcast %188 : vector<1x4x16x1xf32> to vector<1x4x16x128xf32>
    %191 = arith.mulf %189, %190 : vector<1x4x16x128xf32>
    %cst_65 = arith.constant dense<0.000000e+00> : vector<1x4x128xf32>
    %192 = vector.multi_reduction <add>, %191, %cst_65 [2] : vector<1x4x16x128xf32> to vector<1x4x128xf32>
    %193 = vector.shape_cast %186 : vector<4x1xf32> to vector<1x4x1xf32>
    %194 = vector.broadcast %193 : vector<1x4x1xf32> to vector<1x4x128xf32>
    %195 = arith.addf %192, %194 : vector<1x4x128xf32>
    %c1 = arith.constant 1 : index
    %c0_66 = arith.constant 0 : index
    %c0_67 = arith.constant 0 : index
    %196 = vector.load %arg4[%c1, %c0_66, %c0_67] : memref<2x4x1xf32, #tpu.memory_space<vmem>>, vector<1x4x1xf32>
    %197 = vector.shape_cast %196 : vector<1x4x1xf32> to vector<4x1xf32>
    %198 = tpu.iota {dimensions = array<i32: 2>} : vector<1x4x128xi32>
    %c16_i32_68 = arith.constant 16 : i32
    %199 = tpu.dynamic_rotate %195 by %c16_i32_68 dim 2 : vector<1x4x128xf32>, i32 -> vector<1x4x128xf32>
    %c112_i32 = arith.constant 112 : i32
    %200 = tpu.dynamic_rotate %195 by %c112_i32 dim 2 : vector<1x4x128xf32>, i32 -> vector<1x4x128xf32>
    %c16_i32_69 = arith.constant 16 : i32
    %201 = tpu.dynamic_rotate %198 by %c16_i32_69 dim 2 : vector<1x4x128xi32>, i32 -> vector<1x4x128xi32>
    %c16_i32_70 = arith.constant 16 : i32
    %202 = vector.broadcast %c16_i32_70 : i32 to vector<1x4x128xi32>
    %203 = arith.addi %198, %202 : vector<1x4x128xi32>
    %c128_i32_71 = arith.constant 128 : i32
    %c0_i32_72 = arith.constant 0 : i32
    %204 = arith.cmpi eq, %c128_i32_71, %c0_i32_72 : i32
    %c1_i32_73 = arith.constant 1 : i32
    %205 = arith.select %204, %c1_i32_73, %c128_i32_71 : i32
    %206 = vector.broadcast %205 : i32 to vector<1x4x128xi32>
    %207 = arith.remsi %203, %206 : vector<1x4x128xi32>
    %c0_i32_74 = arith.constant 0 : i32
    %208 = vector.broadcast %c0_i32_74 : i32 to vector<1x4x128xi32>
    %209 = arith.cmpi ne, %207, %208 : vector<1x4x128xi32>
    %c0_i32_75 = arith.constant 0 : i32
    %210 = vector.broadcast %c0_i32_75 : i32 to vector<1x4x128xi32>
    %211 = arith.cmpi slt, %207, %210 : vector<1x4x128xi32>
    %c0_i32_76 = arith.constant 0 : i32
    %212 = arith.cmpi slt, %205, %c0_i32_76 : i32
    %213 = vector.broadcast %212 : i1 to vector<1x4x128xi1>
    %214 = vector.broadcast %213 : vector<1x4x128xi1> to vector<1x4x128xi1>
    %215 = arith.xori %211, %214 : vector<1x4x128xi1>
    %216 = arith.andi %215, %209 : vector<1x4x128xi1>
    %217 = vector.broadcast %205 : i32 to vector<1x4x128xi32>
    %218 = arith.addi %207, %217 : vector<1x4x128xi32>
    %219 = arith.select %216, %218, %207 : vector<1x4x128xi1>, vector<1x4x128xi32>
    %220 = arith.cmpi eq, %201, %219 : vector<1x4x128xi32>
    %221 = arith.select %220, %199, %200 : vector<1x4x128xi1>, vector<1x4x128xf32>
    %222 = tpu.iota {dimensions = array<i32: 2>} : vector<1x4x128xi32>
    %c112_i32_77 = arith.constant 112 : i32
    %223 = vector.broadcast %c112_i32_77 : i32 to vector<1x4x128xi32>
    %224 = arith.cmpi slt, %222, %223 : vector<1x4x128xi32>
    %225 = vector.shape_cast %197 : vector<4x1xf32> to vector<1x4x1xf32>
    %226 = vector.broadcast %225 : vector<1x4x1xf32> to vector<1x4x128xf32>
    %227 = arith.mulf %226, %221 : vector<1x4x128xf32>
    %228 = arith.subf %227, %195 : vector<1x4x128xf32>
    %cst_78 = arith.constant 0.000000e+00 : f32
    %229 = vector.broadcast %cst_78 : f32 to vector<1x4x128xf32>
    %230 = arith.select %224, %228, %229 : vector<1x4x128xi1>, vector<1x4x128xf32>
    %c0_79 = arith.constant 0 : index
    %c0_80 = arith.constant 0 : index
    %c0_81 = arith.constant 0 : index
    %231 = vector.load %arg3[%c0_79, %c0_80, %c0_81] : memref<16x4x1xf32, #tpu.memory_space<vmem>>, vector<16x4x1xf32>
    %c0_82 = arith.constant 0 : index
    %c0_83 = arith.constant 0 : index
    %c0_84 = arith.constant 0 : index
    %232 = vector.load %arg5[%c0_82, %c0_83, %c0_84] : memref<1x16x1xf32, #tpu.memory_space<vmem>>, vector<1x16x1xf32>
    %233 = vector.shape_cast %232 : vector<1x16x1xf32> to vector<16x1xf32>
    %234 = vector.shape_cast %230 : vector<1x4x128xf32> to vector<1x1x4x128xf32>
    %235 = vector.shape_cast %231 : vector<16x4x1xf32> to vector<1x16x4x1xf32>
    %236 = vector.broadcast %234 : vector<1x1x4x128xf32> to vector<1x16x4x128xf32>
    %237 = vector.broadcast %235 : vector<1x16x4x1xf32> to vector<1x16x4x128xf32>
    %238 = arith.mulf %236, %237 : vector<1x16x4x128xf32>
    %cst_85 = arith.constant dense<0.000000e+00> : vector<1x16x128xf32>
    %239 = vector.multi_reduction <add>, %238, %cst_85 [2] : vector<1x16x4x128xf32> to vector<1x16x128xf32>
    %240 = vector.shape_cast %233 : vector<16x1xf32> to vector<1x16x1xf32>
    %241 = vector.broadcast %240 : vector<1x16x1xf32> to vector<1x16x128xf32>
    %242 = arith.addf %239, %241 : vector<1x16x128xf32>
    %243 = arith.negf %242 : vector<1x16x128xf32>
    %244 = math.exp %243 : vector<1x16x128xf32>
    %cst_86 = arith.constant 1.000000e+00 : f32
    %245 = vector.broadcast %cst_86 : f32 to vector<1x16x128xf32>
    %246 = arith.addf %245, %244 : vector<1x16x128xf32>
    %247 = arith.divf %245, %246 : vector<1x16x128xf32>
    %cst_87 = arith.constant 1.000000e+00 : f32
    %248 = vector.broadcast %cst_87 : f32 to vector<1x16x128xf32>
    %249 = arith.addf %248, %247 : vector<1x16x128xf32>
    %250 = arith.mulf %0, %249 : vector<1x16x128xf32>
    %c0_88 = arith.constant 0 : index
    %c0_89 = arith.constant 0 : index
    %c0_90 = arith.constant 0 : index
    %251 = vector.load %arg6[%c0_88, %c0_89, %c0_90] : memref<1x16x128xf32, #tpu.memory_space<vmem>>, vector<1x16x128xf32>
    tpu.vector_store %arg6[%c0_88, %c0_89, %c0_90], %250 {strides = array<i32>} : memref<1x16x128xf32, #tpu.memory_space<vmem>>, vector<1x16x128xf32>,
    return
  }
  func.func @transform_0(%arg0: i32) -> (i32, i32, i32) {
    %c0_i32 = arith.constant 0 : i32
    %c0_i32_0 = arith.constant 0 : i32
    %c0_i32_1 = arith.constant 0 : i32
    return %arg0, %c0_i32, %c0_i32_0 : i32, i32, i32
  }
  func.func @transform_1(%arg0: i32) -> (i32, i32, i32) {
    %c0_i32 = arith.constant 0 : i32
    %c0_i32_0 = arith.constant 0 : i32
    %c0_i32_1 = arith.constant 0 : i32
    %c0_i32_2 = arith.constant 0 : i32
    return %c0_i32, %c0_i32_0, %c0_i32_1 : i32, i32, i32
  }
  func.func @transform_2(%arg0: i32) -> (i32, i32, i32) {
    %c0_i32 = arith.constant 0 : i32
    %c0_i32_0 = arith.constant 0 : i32
    %c0_i32_1 = arith.constant 0 : i32
    %c0_i32_2 = arith.constant 0 : i32
    return %c0_i32, %c0_i32_0, %c0_i32_1 : i32, i32, i32
  }
  func.func @transform_3(%arg0: i32) -> (i32, i32, i32) {
    %c0_i32 = arith.constant 0 : i32
    %c0_i32_0 = arith.constant 0 : i32
    %c0_i32_1 = arith.constant 0 : i32
    %c0_i32_2 = arith.constant 0 : i32
    return %c0_i32, %c0_i32_0, %c0_i32_1 : i32, i32, i32
  }
  func.func @transform_4(%arg0: i32) -> (i32, i32, i32) {
    %c0_i32 = arith.constant 0 : i32
    %c0_i32_0 = arith.constant 0 : i32
    %c0_i32_1 = arith.constant 0 : i32
    %c0_i32_2 = arith.constant 0 : i32
    return %c0_i32, %c0_i32_0, %c0_i32_1 : i32, i32, i32
  }
  func.func @transform_5(%arg0: i32) -> (i32, i32, i32) {
    %c0_i32 = arith.constant 0 : i32
    %c0_i32_0 = arith.constant 0 : i32
    %c0_i32_1 = arith.constant 0 : i32
    return %arg0, %c0_i32, %c0_i32_0 : i32, i32, i32
  }
}

</mosaic_0001>

<bundles_post_ra>
// kernel: tme_forward.1
= control target key start
LH: loop header
LB: loop body
LE: loop exit
PB: predicated region body
PF: predicated region fallthrough
CT: control target
= control target key end

     0   :  { %s1434_s18 = smov 0   ;;  %s2084_s0 = inlined_call_operand.vmem [shape: f32[2,16,128], index: 0, kind: input, shape index: {}]   ;;  %s2085_s1 = inlined_call_operand.vmem [shape: f32[4,16,1], index: 1, kind: input, shape index: {}]   ;;  %s2086_s2 = inlined_call_operand.vmem [shape: f32[16,4,1], index: 2, kind: input, shape index: {}]   ;;  %s2087_s3 = inlined_call_operand.vmem [shape: f32[2,4,1], index: 3, kind: input, shape index: {}]   ;;  %s2088_s4 = inlined_call_operand.vmem [shape: f32[1,16,1], index: 4, kind: input, shape index: {}]   ;;  %s2089_s5 = inlined_call_operand.vmem [shape: f32[2,16,128], index: 5, kind: output, shape index: {}]  }
   0x1 LB: > { %s1267_s19 = sadd.s32 4294967295, %s1391_s18   ;;  %p1271_p0 = scmp.ge.s32.totalorder %s1391_s18, 1  ;;  %s1391_s18 = sphi %s1434_s18, %s15_s18  }
   0x2   : > { %p187_p1 = scmp.lt.s32.totalorder %s1391_s18, 3 }
   0x4   : > { %p188_p2 = pnand %p1271_p0, %p187_p1 }
   0x5   : > { %p215_p3 = scmp.lt.s32.totalorder (!%p188_p2), %s1267_s19, 1  ;;  %s1393_s20 = smov (!%p188_p2), 1  }
   0x6   : > { %191 = sbr.rel (%p188_p2) target bundleno = 779 (0x30b), region = 40  ;;  %s1394_s25 = smov (!%p188_p2), 127  }
   0x7   : > { %s1395_s26 = smov (!%p188_p2), 2   ;;  %s1396_s27 = smov (!%p188_p2), 126  }
   0x8   : > { %s1397_s28 = smov (!%p188_p2), 4   ;;  %s1398_s29 = smov (!%p188_p2), 124  }
   0x9   : > { %s1399_s30 = smov (!%p188_p2), 8   ;;  %s1401_s16 = smov (!%p188_p2), 120  }
   0xa   : > { %s1402_s8 = smov (!%p188_p2), 16   ;;  %s1403_s13 = smov (!%p188_p2), 112  }
   0xb   : > { %v227_v0 = vlaneseq  ;;  %s2147_s19 = smov (!%p215_p3, %s1267_s19), 1  ;;  %v413_v36 = vld [vmem:[%s2085_s1 + $0x10] sm:$0xff]  ;;  %v411_v37 = vld [vmem:[%s2085_s1] sm:$0xff]  ;;  %v1400_v38 = vmov 0   ;;  %v412_v39 = vld [vmem:[%s2085_s1 + $0x8] sm:$0xff]  ;;  %vm518_vm8 = vcmask 1041409  }
   0xc   : > { %s1295_s21 = sshll.u32 %s2147_s19, 4  ;;  %1318 = vset.pattern.permute.xlu1 %v1400_v38  ;;  %1316 = vset.pattern.permute.xlu2 %v1400_v38  ;;  %v415_v40 = vld [vmem:[%s2085_s1 + $0x20] sm:$0xff]  ;;  %v414_v41 = vld [vmem:[%s2085_s1 + $0x18] sm:$0xff]  ;;  %v416_v57 = vld [vmem:[%s2085_s1 + $0x28] sm:$0xff]  ;;  %vm521_vm9 = vcmask 1042434   ;;  %vm2094_vm10 = vcmask 1043459  }
   0xd   : > { %v1442_v1 = vand.u32 127, %v227_v0  ;;  %s1453_s24 = scalar_lea.vmem %s2084_s0, %s1295_s21  ;;  %1317 = vset.pattern.permute.xlu0 %v1400_v38  ;;  %v419_v59 = vld [vmem:[%s2087_s3] sm:$0xf]  ;;  %v417_v60 = vld [vmem:[%s2085_s1 + $0x30] sm:$0xff]  ;;  %v418_v61 = vld [vmem:[%s2085_s1 + $0x38] sm:$0xff]  ;;  %vm671_vm13 = vcmask 1043456  }
   0xe   : > { %v226_v2 = vld [vmem:[%s1453_s24 + $0x8] sm:$0xff]  ;;  %v225_v3 = vld [vmem:[%s1453_s24] sm:$0xff] }
   0xf   : > { %237 = vrot.lane.b32.xlu0 %v1442_v1, %s1393_s20  ;;  %231 = vrot.lane.b32.xlu1 %v226_v2, %s1393_s20  ;;  %v239_v4 = vadd.s32 1, %v1442_v1  ;;  %v261_v6 = vand.u32 1, %v1442_v1  ;;  %v284_v21 = vadd.s32 2, %v1442_v1  ;;  %v306_v22 = vand.u32 3, %v1442_v1  ;;  %v1276_v62 = vld [vmem:[%s2087_s3 + $0x4] sm:$0xf] }
  0x10   : > { %235 = vrot.lane.b32.xlu2 %v226_v2, %s1394_s25  ;;  %v329_v43 = vadd.s32 4, %v1442_v1  ;;  %v351_v44 = vand.u32 7, %v1442_v1  ;;  %v557_v63 = vld [vmem:[%s2086_s2] sm:$0xf]  ;;  %v558_v0 = vld [vmem:[%s2086_s2 + $0x4] sm:$0xf] }
  0x11   : > { %v244_v5 = vand.u32 127, %v239_v4  ;;  %vm269_vm1 = vcmp.lt.s32.totalorder %v261_v6, 1  ;;  %v289_v23 = vand.u32 127, %v284_v21  ;;  %vm314_vm2 = vcmp.lt.s32.totalorder %v306_v22, 2  ;;  %v567_v4 = vld [vmem:[%s2086_s2 + $0x28] sm:$0xf] }
  0x12   : > { %v334_v45 = vand.u32 127, %v329_v43  ;;  %vm359_vm4 = vcmp.lt.s32.totalorder %v351_v44, 4  ;;  %v565_v6 = vld [vmem:[%s2086_s2 + $0x20] sm:$0xf]  ;;  %vm548_vm12 = vcmp.lt.s32.totalorder %v1442_v1, 112 }
  0x17   : > { %229 = vrot.lane.b32.xlu0 %v225_v3, %s1393_s20  ;;  %233 = vrot.lane.b32.xlu1 %v225_v3, %s1394_s25 }
  0x18   : > { %282 = vrot.lane.b32.xlu2 %v1442_v1, %s1395_s26 }
  0x6a   : > { %v236_v8 = vpop.permute.xlu2 %235 }
  0x72   : > { %v283_v20 = vpop.permute.xlu2 %282 }
  0x73   : > { %vm297_vm3 = vcmp.eq.s32.totalorder %v283_v20, %v289_v23  ;;  %v396_v20 = vand.u32 15, %v1442_v1 }
  0x75   : > { %vm404_vm7 = vcmp.lt.s32.totalorder %v396_v20, 8 }
  0x81   : > { %v238_v7 = vpop.permute.xlu0 %237  ;;  %v232_v9 = vpop.permute.xlu1 %231 }
  0x82   : > { %vm252_vm0 = vcmp.eq.s32.totalorder %v238_v7, %v244_v5  ;;  %v560_v5 = vld [vmem:[%s2086_s2 + $0xc] sm:$0xf] }
  0x83   : > { %v254_v10 = vsel %vm252_vm0, %v232_v9, %v236_v8  ;;  %v256_v11 = vsel %vm252_vm0, %v236_v8, %v232_v9  ;;  %v568_v7 = vld [vmem:[%s2086_s2 + $0x2c] sm:$0xf]  ;;  %v561_v8 = vld [vmem:[%s2086_s2 + $0x10] sm:$0xf] }
  0x84   : > { %v271_v12 = vsel %vm269_vm1, %v254_v10, %v256_v11  ;;  %v569_v9 = vld [vmem:[%s2086_s2 + $0x30] sm:$0xf]  ;;  %v562_v10 = vld [vmem:[%s2086_s2 + $0x14] sm:$0xf]  ;;  %v571_v11 = vld [vmem:[%s2086_s2 + $0x38] sm:$0xf] }
  0x85   : > { %v273_v13 = vadd.f32 %v271_v12, %v226_v2  ;;  %v566_v2 = vld [vmem:[%s2086_s2 + $0x24] sm:$0xf] }
  0x86   : > { %v573_v12 = vld [vmem:[%s2088_s4] sm:$0xff] }
  0x87   : > { %276 = vrot.lane.b32.xlu1 %v273_v13, %s1395_s26 }
  0x89   : > { %v230_v14 = vpop.permute.xlu0 %229  ;;  %v234_v15 = vpop.permute.xlu1 %233 }
  0x8a   : > { %v253_v16 = vsel %vm252_vm0, %v230_v14, %v234_v15  ;;  %v255_v17 = vsel %vm252_vm0, %v234_v15, %v230_v14 }
  0x8b   : > { %v270_v18 = vsel %vm269_vm1, %v253_v16, %v255_v17 }
  0x8c   : > { %v272_v19 = vadd.f32 %v270_v18, %v225_v3  ;;  %v559_v3 = vld [vmem:[%s2086_s2 + $0x8] sm:$0xf]  ;;  %v374_v18 = vadd.s32 8, %v1442_v1 }
  0x8e   : > { %278 = vrot.lane.b32.xlu2 %v272_v19, %s1396_s27  ;;  %274 = vrot.lane.b32.xlu0 %v272_v19, %s1395_s26 }
  0x8f   : > { %327 = vrot.lane.b32.xlu1 %v1442_v1, %s1397_s28 }
  0x96   : > { %280 = vrot.lane.b32.xlu0 %v273_v13, %s1396_s27 }
  0xe8   : > { %v279_v24 = vpop.permute.xlu2 %278 }
  0xf9   : > { %v277_v30 = vpop.permute.xlu1 %276 }
 0x100   : > { %v275_v25 = vpop.permute.xlu0 %274 }
 0x101   : > { %v298_v26 = vsel %vm297_vm3, %v275_v25, %v279_v24  ;;  %v300_v27 = vsel %vm297_vm3, %v279_v24, %v275_v25  ;;  %v328_v42 = vpop.permute.xlu1 %327 }
 0x102   : > { %v315_v28 = vsel %vm314_vm2, %v298_v26, %v300_v27  ;;  %vm342_vm5 = vcmp.eq.s32.totalorder %v328_v42, %v334_v45 }
 0x103   : > { %v317_v29 = vadd.f32 %v315_v28, %v272_v19  ;;  %v379_v19 = vand.u32 127, %v374_v18 }
 0x105   : > { %323 = vrot.lane.b32.xlu1 %v317_v29, %s1398_s29  ;;  %319 = vrot.lane.b32.xlu2 %v317_v29, %s1397_s28 }
 0x108   : > { %v281_v31 = vpop.permute.xlu0 %280 }
 0x109   : > { %v299_v32 = vsel %vm297_vm3, %v277_v30, %v281_v31  ;;  %v301_v33 = vsel %vm297_vm3, %v281_v31, %v277_v30 }
 0x10a   : > { %v316_v34 = vsel %vm314_vm2, %v299_v32, %v301_v33 }
 0x10b   : > { %v318_v35 = vadd.f32 %v316_v34, %v273_v13 }
 0x10d   : > { %325 = vrot.lane.b32.xlu2 %v318_v35, %s1398_s29  ;;  %321 = vrot.lane.b32.xlu0 %v318_v35, %s1397_s28  ;;  %s1957_s29 = scalar_lea.vmem %s2089_s5, %s1295_s21 }
 0x10e   : > { %372 = vrot.lane.b32.xlu1 %v1442_v1, %s1399_s30 }
 0x115   : > { %422 = vperm.xlu2 %1316, %v411_v37   ;;  %427 = vperm.xlu0 %1317, %v412_v39  }
 0x116   : > { %432 = vperm.xlu1 %1318, %v413_v36  }
 0x11d   : > { %437 = vperm.xlu2 %1316, %v414_v41  }
 0x11e   : > { %442 = vperm.xlu1 %1318, %v415_v40  }
 0x15f   : > { %v320_v46 = vpop.permute.xlu2 %319 }
 0x167   : > { %v326_v52 = vpop.permute.xlu2 %325 }
 0x16f   : > { %v423_v13 = vpop.permute.xlu2 %422 }
 0x177   : > { %v324_v47 = vpop.permute.xlu1 %323  ;;  %v438_v15 = vpop.permute.xlu2 %437 }
 0x178   : > { %v343_v48 = vsel %vm342_vm5, %v320_v46, %v324_v47  ;;  %v345_v49 = vsel %vm342_vm5, %v324_v47, %v320_v46 }
 0x179   : > { %v360_v50 = vsel %vm359_vm4, %v343_v48, %v345_v49 }
 0x17a   : > { %v1482_v51 = vadd.f32 %v360_v50, %v317_v29 }
 0x17c   : > { %368 = vrot.lane.b32.xlu2 %v1482_v51, %s1401_s16  ;;  %364 = vrot.lane.b32.xlu0 %v1482_v51, %s1399_s30 }
 0x17f   : > { %v322_v53 = vpop.permute.xlu0 %321 }
 0x180   : > { %v344_v54 = vsel %vm342_vm5, %v322_v53, %v326_v52  ;;  %v346_v55 = vsel %vm342_vm5, %v326_v52, %v322_v53  ;;  %v373_v14 = vpop.permute.xlu1 %372 }
 0x181   : > { %v361_v56 = vsel %vm359_vm4, %v344_v54, %v346_v55  ;;  %vm387_vm6 = vcmp.eq.s32.totalorder %v373_v14, %v379_v19 }
 0x182   : > { %v1490_v58 = vadd.f32 %v361_v56, %v318_v35 }
 0x184   : > { %447 = vperm.xlu2 %1316, %v416_v57   ;;  %370 = vrot.lane.b32.xlu0 %v1490_v58, %s1401_s16 }
 0x185   : > { %366 = vrot.lane.b32.xlu1 %v1490_v58, %s1399_s30 }
 0x187   : > { %v428_v16 = vpop.permute.xlu0 %427 }
 0x188   : > { %v433_v17 = vpop.permute.xlu1 %432 }
 0x18c   : > { %498 = vperm.xlu2 %1316, %v419_v59   ;;  %452 = vperm.xlu0 %1317, %v417_v60  }
 0x18d   : > { %457 = vperm.xlu1 %1318, %v418_v61  }
 0x190   : > { %v443_v23 = vpop.permute.xlu1 %442 }
 0x194   : > { %531 = vrot.lane.b32.xlu2 %v1442_v1, %s1402_s8  ;;  %551 = vperm.xlu0 %1317, %v1276_v62  }
 0x195   : > { %577 = vperm.xlu1 %1318, %v557_v63  }
 0x19c   : > { %582 = vperm.xlu2 %1316, %v558_v0   ;;  %622 = vperm.xlu0 %1317, %v566_v2  }
 0x19d   : > { %587 = vperm.xlu1 %1318, %v559_v3  }
 0x1a4   : > { %627 = vperm.xlu2 %1316, %v567_v4   ;;  %592 = vperm.xlu0 %1317, %v560_v5  }
 0x1a5   : > { %617 = vperm.xlu1 %1318, %v565_v6  }
 0x1ac   : > { %632 = vperm.xlu2 %1316, %v568_v7   ;;  %597 = vperm.xlu0 %1317, %v561_v8  }
 0x1ad   : > { %637 = vperm.xlu1 %1318, %v569_v9  }
 0x1b4   : > { %602 = vperm.xlu2 %1316, %v562_v10  }
 0x1bc   : > { %647 = vperm.xlu2 %1316, %v571_v11  }
 0x1c4   : > { %786 = vperm.xlu2 %1316, %v573_v12  }
 0x1d6   : > { %v369_v21 = vpop.permute.xlu2 %368 }
 0x1de   : > { %v448_v36 = vpop.permute.xlu2 %447 }
 0x1e6   : > { %v499_v62 = vpop.permute.xlu2 %498 }
 0x1e7   : > { %v500_v8 = vrot.slane %v499_v62, 1  ;;  %v501_v9 = vrot.slane %v499_v62, 2  ;;  %v502_v14 = vrot.slane %v499_v62, 3 }
 0x1ee   : > { %v365_v22 = vpop.permute.xlu0 %364 }
 0x1ef   : > { %v388_v24 = vsel %vm387_vm6, %v365_v22, %v369_v21  ;;  %v390_v25 = vsel %vm387_vm6, %v369_v21, %v365_v22 }
 0x1f0   : > { %v405_v26 = vsel %vm404_vm7, %v388_v24, %v390_v25 }
 0x1f1   : > { %v407_v27 = vadd.f32 %v405_v26, %v1482_v51  ;;  %v563_v26 = vld [vmem:[%s2086_s2 + $0x18] sm:$0xf] }
 0x1f3   : > { %v409_v32 = vmul.f32 0.0625, %v407_v27  ;;  %v570_v27 = vld [vmem:[%s2086_s2 + $0x34] sm:$0xf] }
 0x1f5   : > { %v460_v37 = vmul.f32 %v423_v13, %v409_v32  ;;  %v462_v38 = vmul.f32 %v433_v17, %v409_v32  ;;  %v464_v39 = vmul.f32 %v443_v23, %v409_v32 }
 0x1f6   : > { %v371_v28 = vpop.permute.xlu0 %370 }
 0x1f7   : > { %v367_v29 = vpop.permute.xlu1 %366 }
 0x1f8   : > { %v389_v30 = vsel %vm387_vm6, %v367_v29, %v371_v28  ;;  %v391_v31 = vsel %vm387_vm6, %v371_v28, %v367_v29  ;;  %v572_v28 = vld [vmem:[%s2086_s2 + $0x3c] sm:$0xf] }
 0x1f9   : > { %v406_v33 = vsel %vm404_vm7, %v389_v30, %v391_v31  ;;  %v564_v29 = vld [vmem:[%s2086_s2 + $0x1c] sm:$0xf]  ;;  %v574_v30 = vld [vmem:[%s2088_s4 + $0x8] sm:$0xff]  ;;  %v532_v31 = vpop.permute.xlu2 %531 }
 0x1fa   : > { %v408_v34 = vadd.f32 %v406_v33, %v1490_v58 }
 0x1fc   : > { %v410_v35 = vmul.f32 0.0625, %v408_v34 }
 0x1fe   : > { %v461_v40 = vmul.f32 %v428_v16, %v410_v35  ;;  %v463_v41 = vmul.f32 %v438_v15, %v410_v35  ;;  %v465_v42 = vmul.f32 %v448_v36, %v410_v35  ;;  %v453_v43 = vpop.permute.xlu0 %452 }
 0x1ff   : > { %v458_v44 = vpop.permute.xlu1 %457  ;;  %v466_v45 = vmul.f32 %v453_v43, %v409_v32 }
 0x200   : > { %v468_v46 = vadd.f32 %v461_v40, %v460_v37  ;;  %v475_v47 = vadd.f32 %v463_v41, %v462_v38  ;;  %v482_v48 = vadd.f32 %v465_v42, %v464_v39  ;;  %v467_v49 = vmul.f32 %v458_v44, %v410_v35 }
 0x201   : > { %v583_v32 = vpop.permute.xlu2 %582  ;;  %v533_v42 = vadd.s32 16, %v1442_v1 }
 0x202   : > { %v469_v50 = vrot.slane %v468_v46, 4  ;;  %v476_v51 = vrot.slane %v475_v47, 4  ;;  %v489_v52 = vadd.f32 %v467_v49, %v466_v45  ;;  %v483_v53 = vrot.slane %v482_v48, 4 }
 0x204   : > { %v490_v54 = vrot.slane %v489_v52, 4  ;;  %v470_v55 = vadd.f32 %v469_v50, %v468_v46  ;;  %v477_v56 = vadd.f32 %v476_v51, %v475_v47  ;;  %v484_v57 = vadd.f32 %v483_v53, %v482_v48 }
 0x205   : > { %v538_v46 = vand.u32 127, %v533_v42 }
 0x206   : > { %v491_v58 = vadd.f32 %v490_v54, %v489_v52  ;;  %v471_v59 = vrot.slane %v470_v55, 2  ;;  %v478_v60 = vrot.slane %v477_v56, 2  ;;  %v485_v61 = vrot.slane %v484_v57, 2  ;;  %v552_v34 = vpop.permute.xlu0 %551 }
 0x207   : > { %v578_v33 = vpop.permute.xlu1 %577  ;;  %vm546_vm11 = vcmp.eq.s32.totalorder %v532_v31, %v538_v46 }
 0x208   : > { %v492_v63 = vrot.slane %v491_v58, 2  ;;  %v472_v0 = vadd.f32 %v471_v59, %v470_v55  ;;  %v479_v2 = vadd.f32 %v478_v60, %v477_v56  ;;  %v486_v3 = vadd.f32 %v485_v61, %v484_v57 }
 0x209   : > { %v1571_v35 = vpop.permute.xlu2 %627 }
 0x20a   : > { %v493_v4 = vadd.f32 %v492_v63, %v491_v58  ;;  %v473_v5 = vrot.slane %v472_v0, 1  ;;  %v480_v6 = vrot.slane %v479_v2, 1  ;;  %v487_v7 = vrot.slane %v486_v3, 1 }
 0x20c   : > { %v494_v10 = vrot.slane %v493_v4, 1  ;;  %v474_v11 = vadd.f32 %v473_v5, %v472_v0  ;;  %v481_v12 = vadd.f32 %v480_v6, %v479_v2  ;;  %v488_v13 = vadd.f32 %v487_v7, %v486_v3 }
 0x20e   : > { %v495_v15 = vadd.f32 %v494_v10, %v493_v4  ;;  %v508_v16 = vadd.f32 %v500_v8, %v481_v12  ;;  %v509_v17 = vadd.f32 %v501_v9, %v488_v13  ;;  %v507_v18 = vadd.f32 %v499_v62, %v474_v11  ;;  %v1573_v37 = vpop.permute.xlu0 %622 }
 0x20f   : > { %v588_v36 = vpop.permute.xlu1 %587 }
 0x210   : > { %v510_v19 = vadd.f32 %v502_v14, %v495_v15  ;;  %v517_v20 = vrot.slane %v508_v16, 7  ;;  %v520_v21 = vrot.slane %v509_v17, 6 }
 0x211   : > { %v1575_v38 = vpop.permute.xlu2 %632 }
 0x212   : > { %v519_v22 = vsel %vm518_vm8, %v517_v20, %v507_v18  ;;  %v523_v23 = vrot.slane %v510_v19, 5 }
 0x213   : > { %v522_v24 = vsel %vm521_vm9, %v520_v21, %v519_v22 }
 0x214   : > { %v525_v25 = vsel %vm2094_vm10, %v523_v23, %v522_v24 }
 0x215   : > { %529 = vrot.lane.b32.xlu1 %v525_v25, %s1403_s13  ;;  %527 = vrot.lane.b32.xlu0 %v525_v25, %s1402_s8 }
 0x216   : > { %v593_v40 = vpop.permute.xlu0 %592 }
 0x217   : > { %v1577_v39 = vpop.permute.xlu1 %617 }
 0x219   : > { %v603_v41 = vpop.permute.xlu2 %602 }
 0x21d   : > { %607 = vperm.xlu1 %1318, %v563_v26   ;;  %642 = vperm.xlu0 %1317, %v570_v27  }
 0x21e   : > { %v598_v44 = vpop.permute.xlu0 %597 }
 0x21f   : > { %v1580_v43 = vpop.permute.xlu1 %637 }
 0x221   : > { %v1582_v45 = vpop.permute.xlu2 %647 }
 0x225   : > { %652 = vperm.xlu1 %1318, %v572_v28   ;;  %612 = vperm.xlu0 %1317, %v564_v29  }
 0x229   : > { %v1585_v52 = vpop.permute.xlu2 %786 }
 0x22a   : > { %v792_v58 = vrot.slane %v1585_v52, 1  ;;  %v793_v59 = vrot.slane %v1585_v52, 2 }
 0x22d   : > { %790 = vperm.xlu0 %1317, %v574_v30  }
 0x287   : > { %v530_v47 = vpop.permute.xlu1 %529  ;;  %v528_v48 = vpop.permute.xlu0 %527 }
 0x288   : > { %v547_v49 = vsel %vm546_vm11, %v528_v48, %v530_v47 }
 0x289   : > { %v554_v50 = vmul.f32 %v552_v34, %v547_v49 }
 0x28b   : > { %v555_v51 = vsub.f32 %v554_v50, %v525_v25 }
 0x28d   : > { %v1587_v53 = vsel %vm548_vm12, %v555_v51, 0.0 }
 0x28e   : > { %v655_v54 = vmul.f32 %v578_v33, %v1587_v53  ;;  %v656_v55 = vmul.f32 %v583_v32, %v1587_v53  ;;  %v657_v56 = vmul.f32 %v588_v36, %v1587_v53  ;;  %v658_v57 = vmul.f32 %v593_v40, %v1587_v53 }
 0x28f   : > { %v608_v60 = vpop.permute.xlu1 %607  ;;  %v659_v1 = vmul.f32 %v598_v44, %v1587_v53  ;;  %v660_v61 = vmul.f32 %v603_v41, %v1587_v53  ;;  %v643_v7 = vpop.permute.xlu0 %642  ;;  %v794_v32 = vrot.slane %v1585_v52, 3 }
 0x290   : > { %v661_v62 = vmul.f32 %v608_v60, %v1587_v53  ;;  %v672_v63 = vsel %vm671_vm13, %v655_v54, 0.0  ;;  %v679_v0 = vsel %vm671_vm13, %v656_v55, 0.0  ;;  %v686_v2 = vsel %vm671_vm13, %v657_v56, 0.0 }
 0x291   : > { %v673_v3 = vrot.slane %v672_v63, 4  ;;  %v680_v4 = vrot.slane %v679_v0, 4  ;;  %v687_v5 = vrot.slane %v686_v2, 4  ;;  %v693_v6 = vsel %vm671_vm13, %v658_v57, 0.0 }
 0x292   : > { %v694_v8 = vrot.slane %v693_v6, 4  ;;  %v700_v9 = vsel %vm671_vm13, %v659_v1, 0.0  ;;  %v707_v10 = vsel %vm671_vm13, %v660_v61, 0.0  ;;  %v714_v11 = vsel %vm671_vm13, %v661_v62, 0.0 }
 0x293   : > { %v674_v12 = vadd.f32 %v673_v3, %v672_v63  ;;  %v681_v13 = vadd.f32 %v680_v4, %v679_v0  ;;  %v688_v14 = vadd.f32 %v687_v5, %v686_v2  ;;  %v701_v15 = vrot.slane %v700_v9, 4 }
 0x294   : > { %v695_v16 = vadd.f32 %v694_v8, %v693_v6  ;;  %v708_v17 = vrot.slane %v707_v10, 4  ;;  %v715_v18 = vrot.slane %v714_v11, 4  ;;  %v668_v19 = vmul.f32 %v643_v7, %v1587_v53 }
 0x295   : > { %v675_v20 = vrot.slane %v674_v12, 2  ;;  %v682_v21 = vrot.slane %v681_v13, 2  ;;  %v689_v22 = vrot.slane %v688_v14, 2  ;;  %v702_v23 = vadd.f32 %v701_v15, %v700_v9 }
 0x296   : > { %v696_v24 = vrot.slane %v695_v16, 2  ;;  %v709_v25 = vadd.f32 %v708_v17, %v707_v10  ;;  %v716_v26 = vadd.f32 %v715_v18, %v714_v11  ;;  %v763_v27 = vsel %vm671_vm13, %v668_v19, 0.0 }
 0x297   : > { %v676_v28 = vadd.f32 %v675_v20, %v674_v12  ;;  %v683_v29 = vadd.f32 %v682_v21, %v681_v13  ;;  %v690_v30 = vadd.f32 %v689_v22, %v688_v14  ;;  %v703_v31 = vrot.slane %v702_v23, 2  ;;  %v653_v6 = vpop.permute.xlu1 %652  ;;  %v613_v11 = vpop.permute.xlu0 %612 }
 0x298   : > { %v697_v33 = vadd.f32 %v696_v24, %v695_v16  ;;  %v710_v34 = vrot.slane %v709_v25, 2  ;;  %v717_v36 = vrot.slane %v716_v26, 2  ;;  %v764_v49 = vrot.slane %v763_v27, 4 }
 0x299   : > { %v677_v40 = vrot.slane %v676_v28, 1  ;;  %v684_v41 = vrot.slane %v683_v29, 1  ;;  %v691_v42 = vrot.slane %v690_v30, 1  ;;  %v704_v44 = vadd.f32 %v703_v31, %v702_v23 }
 0x29a   : > { %v698_v46 = vrot.slane %v697_v33, 1  ;;  %v711_v47 = vadd.f32 %v710_v34, %v709_v25  ;;  %v718_v48 = vadd.f32 %v717_v36, %v716_v26  ;;  %v795_v56 = vrot.slane %v1585_v52, 4 }
 0x29b   : > { %v678_v50 = vadd.f32 %v677_v40, %v676_v28  ;;  %v685_v51 = vadd.f32 %v684_v41, %v683_v29  ;;  %v692_v54 = vadd.f32 %v691_v42, %v690_v30  ;;  %v705_v55 = vrot.slane %v704_v44, 1 }
 0x29c   : > { %v699_v57 = vadd.f32 %v698_v46, %v697_v33  ;;  %v712_v60 = vrot.slane %v711_v47, 1  ;;  %v719_v1 = vrot.slane %v718_v48, 1  ;;  %v796_v2 = vrot.slane %v1585_v52, 5 }
 0x29d   : > { %v706_v61 = vadd.f32 %v705_v55, %v704_v44  ;;  %v822_v62 = vadd.f32 %v1585_v52, %v678_v50  ;;  %v823_v63 = vadd.f32 %v792_v58, %v685_v51  ;;  %v824_v0 = vadd.f32 %v793_v59, %v692_v54 }
 0x29e   : > { %v713_v3 = vadd.f32 %v712_v60, %v711_v47  ;;  %v825_v4 = vadd.f32 %v794_v32, %v699_v57  ;;  %v765_v5 = vadd.f32 %v764_v49, %v763_v27  ;;  %v720_v12 = vadd.f32 %v719_v1, %v718_v48 }
 0x29f   : > { %v826_v7 = vadd.f32 %v795_v56, %v706_v61  ;;  %v1277_v8 = vmul.f32 -1.442695, %v822_v62  ;;  %v1278_v9 = vmul.f32 -1.442695, %v823_v63  ;;  %v1279_v10 = vmul.f32 -1.442695, %v824_v0 }
 0x2a0   : > { %v827_v13 = vadd.f32 %v796_v2, %v713_v3  ;;  %v1280_v14 = vmul.f32 -1.442695, %v825_v4  ;;  %v797_v15 = vrot.slane %v1585_v52, 6  ;;  %v670_v58 = vmul.f32 %v653_v6, %v1587_v53 }
 0x2a1   : > { %1319 = vpow2.f32 %v1277_v8  ;;  %v1281_v16 = vmul.f32 -1.442695, %v826_v7  ;;  %v766_v17 = vrot.slane %v765_v5, 2  ;;  %v662_v18 = vmul.f32 %v613_v11, %v1587_v53 }
 0x2a2   : > { %1321 = vpow2.f32 %v1278_v9  ;;  %v1282_v59 = vmul.f32 -1.442695, %v827_v13  ;;  %v828_v19 = vadd.f32 %v797_v15, %v720_v12  ;;  %v777_v20 = vsel %vm671_vm13, %v670_v58, 0.0 }
 0x2a3   : > { %1323 = vpow2.f32 %v1279_v10  ;;  %v767_v21 = vadd.f32 %v766_v17, %v765_v5  ;;  %v721_v22 = vsel %vm671_vm13, %v662_v18, 0.0  ;;  %v778_v27 = vrot.slane %v777_v20, 4 }
 0x2a4   : > { %1325 = vpow2.f32 %v1280_v14  ;;  %v1283_v25 = vmul.f32 -1.442695, %v828_v19  ;;  %v722_v30 = vrot.slane %v721_v22, 4  ;;  %v663_v34 = vmul.f32 %v1577_v39, %v1587_v53 }
 0x2a5   : > { %1327 = vpow2.f32 %v1281_v16  ;;  %v768_v33 = vrot.slane %v767_v21, 1  ;;  %v664_v41 = vmul.f32 %v1573_v37, %v1587_v53  ;;  %v665_v42 = vmul.f32 %v1571_v35, %v1587_v53 }
 0x2a6   : > { %1329 = vpow2.f32 %v1282_v59  ;;  %v1634_v47 = vadd.f32 %v778_v27, %v777_v20  ;;  %v1637_v39 = vadd.f32 %v722_v30, %v721_v22  ;;  %v798_v49 = vrot.slane %v1585_v52, 7 }
 0x2a7   : > { %v1320_v23 = vpop.eup %1319  ;;  %v1639_v48 = vadd.f32 %v768_v33, %v767_v21  ;;  %v666_v37 = vmul.f32 %v1575_v38, %v1587_v53  ;;  %v1645_v50 = vsel %vm671_vm13, %v663_v34, 0.0  ;;  %v1651_v51 = vsel %vm671_vm13, %v664_v41, 0.0 }
 0x2a8   : > { %v1322_v24 = vpop.eup %1321  ;;  %v1616_v26 = vadd.f32 1.0, %v1320_v23  ;;  %v1654_v54 = vsel %vm671_vm13, %v665_v42, 0.0  ;;  %v780_v56 = vrot.slane %v1634_v47, 2  ;;  %v1662_v38 = vmul.f32 %v1580_v43, %v1587_v53 }
 0x2a9   : > { %v1324_v28 = vpop.eup %1323  ;;  %v1618_v29 = vadd.f32 1.0, %v1322_v24  ;;  %v1666_v57 = vmul.f32 %v1582_v45, %v1587_v53  ;;  %v724_v62 = vrot.slane %v1637_v39, 2  ;;  %v729_v63 = vrot.slane %v1645_v50, 4 }
 0x2aa   : > { %v1326_v31 = vpop.eup %1325  ;;  %v1620_v32 = vadd.f32 1.0, %v1324_v28  ;;  %1331 = vrcp.f32 %v1616_v26  ;;  %v913_v61 = vand.u32 2147483648, %v1616_v26  ;;  %v736_v2 = vrot.slane %v1651_v51, 4 }
 0x2ab   : > { %v1328_v36 = vpop.eup %1327  ;;  %v1625_v40 = vadd.f32 1.0, %v1326_v31  ;;  %1333 = vrcp.f32 %v1618_v29  ;;  %v743_v45 = vrot.slane %v1654_v54, 4  ;;  %v1680_v53 = vsel %vm671_vm13, %v666_v37, 0.0 }
 0x2ac   : > { %v1330_v44 = vpop.eup %1329  ;;  %1335 = vpow2.f32 %v1283_v25  ;;  %v1632_v46 = vadd.f32 1.0, %v1328_v36  ;;  %v926_v5 = vand.u32 2147483647, %v1618_v29  ;;  %v928_v6 = vand.u32 2147483648, %v1618_v29 }
 0x2ad   : > { %1337 = vrcp.f32 %v1620_v32  ;;  %v1647_v35 = vadd.f32 1.0, %v1330_v44  ;;  %vm907_vm14 = vweird.f32 %v1616_v26  ;;  %v911_v7 = vand.u32 2147483647, %v1616_v26 }
 0x2ae   : > { %1339 = vrcp.f32 %v1625_v40  ;;  %v914_v12 = vor.u32 1.1754944e-38, %v913_v61  ;;  %vm922_vm15 = vweird.f32 %v1618_v29  ;;  %vm937_vm0 = vweird.f32 %v1620_v32 }
 0x2af   : > { %1341 = vrcp.f32 %v1632_v46  ;;  %vm1703_vm1 = vcmp.eq.f32.partialorder %v926_v5, 8.507059e+37  ;;  %v929_v17 = vor.u32 1.1754944e-38, %v928_v6  ;;  %v941_v18 = vand.u32 2147483647, %v1620_v32 }
 0x2b0   : > { %v1656_v55 = vpop.eup %1331  ;;  %1343 = vrcp.f32 %v1647_v35  ;;  %vm1711_vm3 = vcmp.eq.f32.partialorder %v911_v7, 8.507059e+37  ;;  %v943_v22 = vand.u32 2147483648, %v1620_v32  ;;  %vm952_vm5 = vweird.f32 %v1625_v40 }
 0x2b1   : > { %v1668_v60 = vpop.eup %1333  ;;  %v903_v1 = vmul.f32 %v1656_v55, %v1616_v26  ;;  %vm908_vm2 = vweird.f32 %v1656_v55  ;;  %vm1732_vm11 = vcmp.eq.f32.partialorder %v941_v18, 8.507059e+37  ;;  %v956_v36 = vand.u32 2147483647, %v1625_v40 }
 0x2b2   : > { %v1336_v0 = vpop.eup %1335  ;;  %v918_v43 = vmul.f32 %v1668_v60, %v1618_v29  ;;  %vm923_vm4 = vweird.f32 %v1668_v60  ;;  %vm1728_vm7 = vmor %vm907_vm14, %vm908_vm2  ;;  %v958_v37 = vand.u32 2147483648, %v1625_v40  ;;  %v971_v61 = vand.u32 2147483647, %v1632_v46 }
 0x2b3   : > { %v1682_v3 = vpop.eup %1337  ;;  %v904_v4 = vsub.f32 1.0, %v903_v1  ;;  %v1693_v11 = vadd.f32 1.0, %v1336_v0  ;;  %vm1742_vm12 = vmor %vm922_vm15, %vm923_vm4  ;;  %vm967_vm15 = vweird.f32 %v1632_v46  ;;  %v944_v5 = vor.u32 1.1754944e-38, %v943_v22 }
 0x2b4   : > { %v919_v8 = vsub.f32 1.0, %v918_v43  ;;  %v933_v9 = vmul.f32 %v1682_v3, %v1620_v32  ;;  %v1691_v10 = vpop.eup %1339  ;;  %vm938_vm6 = vweird.f32 %v1682_v3  ;;  %v988_v32 = vand.u32 2147483648, %v1647_v35 }
 0x2b5   : > { %v1697_v13 = vpop.eup %1341  ;;  %v905_v14 = vmul.f32 %v1656_v55, %v904_v4  ;;  %v948_v58 = vmul.f32 %v1691_v10, %v1625_v40  ;;  %vm953_vm14 = vweird.f32 %v1691_v10  ;;  %1345 = vrcp.f32 %v1693_v11  ;;  %vm1755_vm2 = vmor %vm937_vm0, %vm938_vm6 }
 0x2b6   : > { %v920_v15 = vmul.f32 %v1668_v60, %v919_v8  ;;  %v934_v16 = vsub.f32 1.0, %v933_v9  ;;  %v963_v19 = vmul.f32 %v1697_v13, %v1632_v46  ;;  %v1717_v24 = vpop.eup %1343  ;;  %vm1771_vm0 = vmor %vm952_vm5, %vm953_vm14  ;;  %vm1775_vm4 = vcmp.eq.f32.partialorder %v956_v36, 8.507059e+37 }
 0x2b7   : > { %v949_v23 = vsub.f32 1.0, %v948_v58  ;;  %v906_v28 = vadd.f32 %v1656_v55, %v905_v14  ;;  %v978_v42 = vmul.f32 %v1717_v24, %v1647_v35  ;;  %vm968_vm6 = vweird.f32 %v1697_v13 }
 0x2b8   : > { %v935_v21 = vmul.f32 %v1682_v3, %v934_v16  ;;  %v921_v25 = vadd.f32 %v1668_v60, %v920_v15  ;;  %v964_v27 = vsub.f32 1.0, %v963_v19  ;;  %v959_v40 = vor.u32 1.1754944e-38, %v958_v37 }
 0x2b9   : > { %v950_v31 = vmul.f32 %v1691_v10, %v949_v23  ;;  %v979_v0 = vsub.f32 1.0, %v978_v42  ;;  %v910_v43 = vsel %vm1728_vm7, %v1656_v55, %v906_v28  ;;  %vm982_vm5 = vweird.f32 %v1647_v35 }
 0x2ba   : > { %v936_v30 = vadd.f32 %v1682_v3, %v935_v21  ;;  %v965_v41 = vmul.f32 %v1697_v13, %v964_v27  ;;  %v925_v1 = vsel %vm1742_vm12, %v1668_v60, %v921_v25  ;;  %v973_v60 = vand.u32 2147483648, %v1632_v46 }
 0x2bb   : > { %v951_v26 = vadd.f32 %v1691_v10, %v950_v31  ;;  %v915_v9 = vsel %vm1711_vm3, %v914_v12, %v910_v43  ;;  %vm1791_vm7 = vcmp.eq.f32.partialorder %v971_v61, 8.507059e+37  ;;  %v980_v16 = vmul.f32 %v1717_v24, %v979_v0  ;;  %v1796_v58 = vpop.eup %1345 }
 0x2bc   : > { %v940_v4 = vsel %vm1755_vm2, %v1682_v3, %v936_v30  ;;  %v966_v55 = vadd.f32 %v1697_v13, %v965_v41  ;;  %v930_v3 = vsel %vm1703_vm1, %v929_v17, %v925_v1  ;;  %vm1800_vm1 = vmor %vm967_vm15, %vm968_vm6  ;;  %v974_v59 = vor.u32 1.1754944e-38, %v973_v60 }
 0x2bd   : > { %v955_v8 = vsel %vm1771_vm0, %v1691_v10, %v951_v26  ;;  %v945_v14 = vsel %vm1732_vm11, %v944_v5, %v940_v4  ;;  %vm983_vm3 = vweird.f32 %v1717_v24  ;;  %v986_v12 = vand.u32 2147483647, %v1647_v35  ;;  %v791_v5 = vpop.permute.xlu0 %790 }
 0x2be   : > { %v1806_v17 = vor.u32 1.1754944e-38, %v988_v32  ;;  %v960_v18 = vsel %vm1775_vm4, %v959_v40, %v955_v8  ;;  %v970_v19 = vsel %vm1800_vm1, %v1697_v13, %v966_v55  ;;  %v1143_v20 = vadd.f32 1.0, %v930_v3  ;;  %vm1847_vm11 = vmor %vm982_vm5, %vm983_vm3 }
 0x2bf   : > { %v725_v46 = vadd.f32 %v724_v62, %v1637_v39  ;;  %v1001_v21 = vand.u32 2147483647, %v1693_v11  ;;  %v1003_v22 = vand.u32 2147483648, %v1693_v11  ;;  %v1142_v23 = vadd.f32 1.0, %v915_v9 }
 0x2c0   : > { %v1818_v25 = vadd.f32 1.0, %v945_v14  ;;  %v1821_v27 = vadd.f32 %v1717_v24, %v980_v16  ;;  %v993_v28 = vmul.f32 %v1796_v58, %v1693_v11  ;;  %v730_v13 = vadd.f32 %v729_v63, %v1645_v50  ;;  %v1383_v63 = vld [vmem:[%s1453_s24] sm:$0xff] }
 0x2c1   : > { %v726_v30 = vrot.slane %v725_v46, 1  ;;  %v1830_v39 = vsel %vm1791_vm7, %v974_v59, %v970_v19  ;;  %v1832_v62 = vadd.f32 1.0, %v960_v18  ;;  %v781_v31 = vadd.f32 %v780_v56, %v1634_v47 }
 0x2c2   : > { %v737_v33 = vadd.f32 %v736_v2, %v1651_v51  ;;  %v1174_v34 = vrot.slane %v1143_v20, 7  ;;  %v731_v41 = vrot.slane %v730_v13, 2  ;;  %v744_v50 = vadd.f32 %v743_v45, %v1654_v54 }
 0x2c3   : > { %v727_v36 = vadd.f32 %v726_v30, %v725_v46  ;;  %v1176_v47 = vrot.slane %v1818_v25, 6  ;;  %v750_v51 = vrot.slane %v1680_v53, 4  ;;  %v756_v2 = vsel %vm671_vm13, %v1662_v38, 0.0 }
 0x2c4   : > { %v738_v56 = vrot.slane %v737_v33, 2  ;;  %v985_v54 = vsel %vm1847_vm11, %v1717_v24, %v1821_v27  ;;  %v994_v45 = vsub.f32 1.0, %v993_v28  ;;  %v732_v42 = vadd.f32 %v731_v41, %v730_v13 }
 0x2c5   : > { %v829_v35 = vadd.f32 %v798_v49, %v727_v36  ;;  %v782_v44 = vrot.slane %v781_v31, 1  ;;  %v745_v37 = vrot.slane %v744_v50, 2  ;;  %v751_v1 = vadd.f32 %v750_v51, %v1680_v53 }
 0x2c6   : > { %v739_v26 = vadd.f32 %v738_v56, %v737_v33  ;;  %v733_v61 = vrot.slane %v732_v42, 1  ;;  %v757_v0 = vrot.slane %v756_v2, 4  ;;  %v770_v38 = vsel %vm671_vm13, %v1666_v57, 0.0 }
 0x2c7   : > { %v1284_v29 = vmul.f32 -1.442695, %v829_v35  ;;  %v1175_v43 = vsel %vm518_vm8, %v1174_v34, %v1142_v23  ;;  %v746_v60 = vadd.f32 %v745_v37, %v744_v50  ;;  %v752_v32 = vrot.slane %v751_v1, 2 }
 0x2c8   : > { %v740_v4 = vrot.slane %v739_v26, 1  ;;  %v995_v52 = vmul.f32 %v1796_v58, %v994_v45  ;;  %v758_v49 = vadd.f32 %v757_v0, %v756_v2  ;;  %v771_v6 = vrot.slane %v770_v38, 4 }
 0x2c9   : > { %1347 = vpow2.f32 %v1284_v29  ;;  %vm998_vm12 = vweird.f32 %v1796_v58  ;;  %v783_v53 = vadd.f32 %v782_v44, %v781_v31  ;;  %v734_v7 = vadd.f32 %v733_v61, %v732_v42 }
 0x2ca   : > { %v747_v55 = vrot.slane %v746_v60, 1  ;;  %v753_v3 = vadd.f32 %v752_v32, %v751_v1  ;;  %vm1867_vm14 = vcmp.eq.f32.partialorder %v986_v12, 8.507059e+37  ;;  %v759_v57 = vrot.slane %v758_v49, 2 }
 0x2cb   : > { %v772_v40 = vadd.f32 %v771_v6, %v770_v38  ;;  %v799_v9 = vrot.slane %v791_v5, 1  ;;  %v800_v14 = vrot.slane %v791_v5, 2  ;;  %vm997_vm13 = vweird.f32 %v1693_v11 }
 0x2cc   : > { %v741_v15 = vadd.f32 %v740_v4, %v739_v26  ;;  %v748_v16 = vadd.f32 %v747_v55, %v746_v60  ;;  %v754_v10 = vrot.slane %v753_v3, 1  ;;  %v801_v59 = vrot.slane %v791_v5, 3  ;;  %vm1894_vm2 = vmor %vm997_vm13, %vm998_vm12 }
 0x2cd   : > { %v760_v18 = vadd.f32 %v759_v57, %v758_v49  ;;  %v773_v19 = vrot.slane %v772_v40, 2  ;;  %v802_v20 = vrot.slane %v791_v5, 4  ;;  %v803_v46 = vrot.slane %v791_v5, 5 }
 0x2ce   : > { %v755_v23 = vadd.f32 %v754_v10, %v753_v3  ;;  %v804_v28 = vrot.slane %v791_v5, 6  ;;  %v830_v12 = vadd.f32 %v791_v5, %v734_v7  ;;  %v831_v30 = vadd.f32 %v799_v9, %v741_v15 }
 0x2cf   : > { %v1348_v13 = vpop.eup %1347  ;;  %v761_v31 = vrot.slane %v760_v18, 1  ;;  %v774_v33 = vadd.f32 %v773_v19, %v772_v40  ;;  %v805_v34 = vrot.slane %v791_v5, 7  ;;  %v832_v36 = vadd.f32 %v800_v14, %v748_v16 }
 0x2d0   : > { %v1872_v41 = vadd.f32 1.0, %v1348_v13  ;;  %v833_v50 = vadd.f32 %v801_v59, %v755_v23  ;;  %v835_v56 = vadd.f32 %v803_v46, %v1639_v48  ;;  %v1285_v51 = vmul.f32 -1.442695, %v830_v12 }
 0x2d1   : > { %v762_v2 = vadd.f32 %v761_v31, %v760_v18  ;;  %v775_v45 = vrot.slane %v774_v33, 1  ;;  %v1286_v35 = vmul.f32 -1.442695, %v831_v30  ;;  %v1287_v42 = vmul.f32 -1.442695, %v832_v36 }
 0x2d2   : > { %v996_v44 = vadd.f32 %v1796_v58, %v995_v52  ;;  %v1146_v26 = vadd.f32 1.0, %v1830_v39  ;;  %1349 = vrcp.f32 %v1872_v41  ;;  %v837_v37 = vadd.f32 %v805_v34, %v783_v53 }
 0x2d3   : > { %v776_v1 = vadd.f32 %v775_v45, %v774_v33  ;;  %v834_v29 = vadd.f32 %v802_v20, %v762_v2  ;;  %1351 = vpow2.f32 %v1285_v51  ;;  %v1288_v61 = vmul.f32 -1.442695, %v833_v50 }
 0x2d4   : > { %v990_v48 = vsel %vm1867_vm14, %v1806_v17, %v985_v54  ;;  %v1177_v39 = vsel %vm521_vm9, %v1176_v47, %v1175_v43  ;;  %v1178_v0 = vrot.slane %v1832_v62, 5  ;;  %1353 = vpow2.f32 %v1286_v35 }
 0x2d5   : > { %v836_v24 = vadd.f32 %v804_v28, %v776_v1  ;;  %1355 = vpow2.f32 %v1287_v42  ;;  %v1289_v27 = vmul.f32 -1.442695, %v834_v29  ;;  %v1290_v38 = vmul.f32 -1.442695, %v835_v56 }
 0x2d6   : > { %vm2093_vm15 = vcmask 1044484   ;;  %v1000_v17 = vsel %vm1894_vm2, %v1796_v58, %v996_v44  ;;  %v1004_v25 = vor.u32 1.1754944e-38, %v1003_v22  ;;  %1357 = vpow2.f32 %v1288_v61 }
 0x2d7   : > { %v1147_v62 = vadd.f32 1.0, %v990_v48  ;;  %v1179_v47 = vsel %vm2094_vm10, %v1178_v0, %v1177_v39  ;;  %v1291_v54 = vmul.f32 -1.442695, %v836_v24  ;;  %v1292_v43 = vmul.f32 -1.442695, %v837_v37 }
 0x2d8   : > { %v1350_v4 = vpop.eup %1349  ;;  %vm1002_vm0 = vcmp.eq.f32.partialorder %v1001_v21, 8.507059e+37  ;;  %v1180_v60 = vrot.slane %v1146_v26, 4  ;;  %1359 = vpow2.f32 %v1289_v27  ;;  %vm2092_vm4 = vcmask 1045509  }
 0x2d9   : > { %v1352_v32 = vpop.eup %1351  ;;  %v1005_v5 = vsel %vm1002_vm0, %v1004_v25, %v1000_v17  ;;  %v1008_v52 = vmul.f32 %v1350_v4, %v1872_v41  ;;  %1361 = vpow2.f32 %v1290_v38  ;;  %v1183_v53 = vrot.slane %v1147_v62, 3 }
 0x2da   : > { %v1354_v58 = vpop.eup %1353  ;;  %v1182_v22 = vsel %vm2093_vm15, %v1180_v60, %v1179_v47  ;;  %1363 = vpow2.f32 %v1291_v54  ;;  %v1908_v49 = vadd.f32 1.0, %v1352_v32  ;;  %v1148_v55 = vadd.f32 1.0, %v1005_v5 }
 0x2db   : > { %v1356_v6 = vpop.eup %1355  ;;  %v1009_v7 = vsub.f32 1.0, %v1008_v52  ;;  %1365 = vpow2.f32 %v1292_v43  ;;  %v1910_v11 = vadd.f32 1.0, %v1354_v58  ;;  %v1018_v3 = vand.u32 2147483648, %v1872_v41 }
 0x2dc   : > { %v1358_v21 = vpop.eup %1357  ;;  %v1913_v8 = vadd.f32 1.0, %v1356_v6  ;;  %1367 = vrcp.f32 %v1908_v49  ;;  %vm1013_vm6 = vweird.f32 %v1350_v4  ;;  %v1016_v40 = vand.u32 2147483647, %v1872_v41 }
 0x2dd   : > { %v1010_v57 = vmul.f32 %v1350_v4, %v1009_v7  ;;  %1369 = vrcp.f32 %v1910_v11  ;;  %v1918_v14 = vadd.f32 1.0, %v1358_v21  ;;  %vm2091_vm5 = vcmask 1046534  }
 0x2de   : > { %v1360_v9 = vpop.eup %1359  ;;  %v1185_v16 = vsel %vm2092_vm4, %v1183_v53, %v1182_v22  ;;  %vm1012_vm7 = vweird.f32 %v1872_v41  ;;  %v1186_v18 = vrot.slane %v1148_v55, 2  ;;  %v1019_v19 = vor.u32 1.1754944e-38, %v1018_v3 }
 0x2df   : > { %v1362_v15 = vpop.eup %1361  ;;  %v1011_v10 = vadd.f32 %v1350_v4, %v1010_v57  ;;  %vm1014_vm1 = vmor %vm1012_vm7, %vm1013_vm6  ;;  %v1033_v20 = vand.u32 2147483648, %v1908_v49  ;;  %1371 = vrcp.f32 %v1913_v8  ;;  %vm1017_vm3 = vcmp.eq.f32.partialorder %v1016_v40, 8.507059e+37 }
 0x2e0   : > { %v1364_v59 = vpop.eup %1363  ;;  %v1924_v28 = vadd.f32 1.0, %v1360_v9  ;;  %v1188_v30 = vsel %vm2091_vm5, %v1186_v18, %v1185_v16  ;;  %vm2090_vm11 = vcmask 1047559   ;;  %1373 = vrcp.f32 %v1918_v14 }
 0x2e1   : > { %v1366_v46 = vpop.eup %1365  ;;  %v1015_v23 = vsel %vm1014_vm1, %v1350_v4, %v1011_v10  ;;  %v1031_v36 = vand.u32 2147483647, %v1908_v49  ;;  %v1048_v41 = vand.u32 2147483648, %v1910_v11  ;;  %v1936_v50 = vadd.f32 1.0, %v1362_v15 }
 0x2e2   : > { %v1926_v12 = vpop.eup %1367  ;;  %v1020_v13 = vsel %vm1017_vm3, %v1019_v19, %v1015_v23  ;;  %v1938_v56 = vor.u32 1.1754944e-38, %v1033_v20  ;;  %vm1042_vm12 = vweird.f32 %v1910_v11  ;;  %v1046_v2 = vand.u32 2147483647, %v1910_v11  ;;  %v1384_v19 = vld [vmem:[%s1453_s24 + $0x8] sm:$0xff] }
 0x2e3   : > { %v1930_v31 = vpop.eup %1369  ;;  %v1149_v33 = vadd.f32 1.0, %v1020_v13  ;;  %v1023_v34 = vmul.f32 %v1926_v12, %v1908_v49  ;;  %v1944_v35 = vadd.f32 1.0, %v1364_v59  ;;  %1375 = vrcp.f32 %v1924_v28 }
 0x2e4   : > { %v1038_v51 = vmul.f32 %v1930_v31, %v1910_v11  ;;  %v1947_v26 = vadd.f32 1.0, %v1366_v46  ;;  %vm1027_vm14 = vweird.f32 %v1908_v49  ;;  %vm1057_vm13 = vweird.f32 %v1913_v8 }
 0x2e5   : > { %v1189_v45 = vrot.slane %v1149_v33, 1  ;;  %v1024_v42 = vsub.f32 1.0, %v1023_v34  ;;  %v1372_v44 = vpop.eup %1371  ;;  %v1061_v1 = vand.u32 2147483647, %v1913_v8  ;;  %v1049_v61 = vor.u32 1.1754944e-38, %v1048_v41 }
 0x2e6   : > { %v1039_v37 = vsub.f32 1.0, %v1038_v51  ;;  %v1053_v48 = vmul.f32 %v1372_v44, %v1913_v8  ;;  %v1063_v39 = vand.u32 2147483648, %v1913_v8  ;;  %v1374_v0 = vpop.eup %1373  ;;  %vm1965_vm2 = vcmp.eq.f32.partialorder %v1046_v2, 8.507059e+37 }
 0x2e7   : > { %v1191_v29 = vsel %vm2090_vm11, %v1189_v45, %v1188_v30  ;;  %v1025_v27 = vmul.f32 %v1926_v12, %v1024_v42  ;;  %vm1072_vm0 = vweird.f32 %v1918_v14  ;;  %vm1028_vm6 = vweird.f32 %v1926_v12 }
 0x2e8   : > { %v1208_v24 = vmul.f32 %v1383_v63, %v1191_v29  ;;  %v1040_v38 = vmul.f32 %v1930_v31, %v1039_v37  ;;  %v1054_v25 = vsub.f32 1.0, %v1053_v48  ;;  %v1068_v62 = vmul.f32 %v1374_v0, %v1918_v14 }
 0x2e9   : > { %v1076_v47 = vand.u32 2147483647, %v1918_v14  ;;  %vm1974_vm7 = vcmp.eq.f32.partialorder %v1031_v36, 8.507059e+37  ;;  %vm1043_vm1 = vweird.f32 %v1930_v31  ;;  %vm1980_vm3 = vcmp.eq.f32.partialorder %v1061_v1, 8.507059e+37  ;;  %v1376_v60 = vpop.eup %1375 }
 0x2ea   : > { %1210 = vst [vmem:[%s1957_s29] sm:$0xff] %v1208_v24  ;;  %v1041_v43 = vadd.f32 %v1930_v31, %v1040_v38  ;;  %1377 = vrcp.f32 %v1936_v50  ;;  %v1055_v32 = vmul.f32 %v1372_v44, %v1054_v25  ;;  %vm1058_vm11 = vweird.f32 %v1372_v44  ;;  %vm1991_vm5 = vmor %vm1042_vm12, %vm1043_vm1 }
 0x2eb   : > { %v1069_v5 = vsub.f32 1.0, %v1068_v62  ;;  %v1078_v52 = vand.u32 2147483648, %v1918_v14  ;;  %v1026_v58 = vadd.f32 %v1926_v12, %v1025_v27  ;;  %v1064_v22 = vor.u32 1.1754944e-38, %v1063_v39  ;;  %vm2004_vm10 = vmor %vm1057_vm13, %vm1058_vm11 }
 0x2ec   : > { %v1083_v6 = vmul.f32 %v1376_v60, %v1924_v28  ;;  %v1091_v53 = vand.u32 2147483647, %v1924_v28  ;;  %v1056_v21 = vadd.f32 %v1372_v44, %v1055_v32  ;;  %vm1073_vm4 = vweird.f32 %v1374_v0  ;;  %vm2014_vm1 = vmor %vm1027_vm14, %vm1028_vm6 }
 0x2ed   : > { %v1070_v55 = vmul.f32 %v1374_v0, %v1069_v5  ;;  %vm1995_vm15 = vcmp.eq.f32.partialorder %v1076_v47, 8.507059e+37  ;;  %v1045_v57 = vsel %vm1991_vm5, %v1930_v31, %v1041_v43  ;;  %vm1087_vm12 = vweird.f32 %v1924_v28  ;;  %vm1074_vm5 = vmor %vm1072_vm0, %vm1073_vm4 }
 0x2ee   : > { %v1084_v11 = vsub.f32 1.0, %v1083_v6  ;;  %1379 = vrcp.f32 %v1944_v35  ;;  %v1060_v8 = vsel %vm2004_vm10, %v1372_v44, %v1056_v21  ;;  %v1079_v16 = vor.u32 1.1754944e-38, %v1078_v52 }
 0x2ef   : > { %v1071_v15 = vadd.f32 %v1374_v0, %v1070_v55  ;;  %v1093_v10 = vand.u32 2147483648, %v1924_v28  ;;  %v1030_v18 = vsel %vm2014_vm1, %v1926_v12, %v1026_v58  ;;  %vm1088_vm11 = vweird.f32 %v1376_v60 }
 0x2f0   : > { %v1378_v59 = vpop.eup %1377  ;;  %v1085_v49 = vmul.f32 %v1376_v60, %v1084_v11  ;;  %vm2026_vm14 = vcmp.eq.f32.partialorder %v1091_v53, 8.507059e+37  ;;  %v1050_v20 = vsel %vm1965_vm2, %v1049_v61, %v1045_v57  ;;  %v1065_v46 = vsel %vm1980_vm3, %v1064_v22, %v1060_v8  ;;  %vm1089_vm4 = vmor %vm1087_vm12, %vm1088_vm11 }
 0x2f1   : > { %v1075_v23 = vsel %vm1074_vm5, %v1374_v0, %v1071_v15  ;;  %v1098_v30 = vmul.f32 %v1378_v59, %v1936_v50  ;;  %vm1102_vm10 = vweird.f32 %v1936_v50  ;;  %v1106_v14 = vand.u32 2147483647, %v1936_v50 }
 0x2f2   : > { %v1086_v13 = vadd.f32 %v1376_v60, %v1085_v49  ;;  %1381 = vrcp.f32 %v1947_v26  ;;  %v1035_v12 = vsel %vm1974_vm7, %v1938_v56, %v1030_v18  ;;  %v1080_v31 = vsel %vm1995_vm15, %v1079_v16, %v1075_v23 }
 0x2f3   : > { %v1094_v33 = vor.u32 1.1754944e-38, %v1093_v10  ;;  %v1099_v34 = vsub.f32 1.0, %v1098_v30  ;;  %v1108_v51 = vand.u32 2147483648, %v1936_v50  ;;  %v1151_v2 = vadd.f32 1.0, %v1050_v20 }
 0x2f4   : > { %v1380_v36 = vpop.eup %1379  ;;  %v1090_v41 = vsel %vm1089_vm4, %v1376_v60, %v1086_v13  ;;  %v1152_v45 = vadd.f32 1.0, %v1065_v46  ;;  %vm1103_vm13 = vweird.f32 %v1378_v59  ;;  %vm2049_vm2 = vcmp.eq.f32.partialorder %v1106_v14, 8.507059e+37 }
 0x2f5   : > { %v1095_v42 = vsel %vm2026_vm14, %v1094_v33, %v1090_v41  ;;  %v1100_v44 = vmul.f32 %v1378_v59, %v1099_v34  ;;  %v1113_v56 = vmul.f32 %v1380_v36, %v1944_v35  ;;  %vm1117_vm15 = vweird.f32 %v1944_v35  ;;  %vm1104_vm0 = vmor %vm1102_vm10, %vm1103_vm13 }
 0x2f6   : > { %v1121_v28 = vand.u32 2147483647, %v1944_v35  ;;  %v1153_v1 = vadd.f32 1.0, %v1080_v31  ;;  %v1192_v48 = vrot.slane %v1151_v2, 7  ;;  %v1194_v39 = vrot.slane %v1152_v45, 6 }
 0x2f7   : > { %v1101_v29 = vadd.f32 %v1378_v59, %v1100_v44  ;;  %v1114_v61 = vsub.f32 1.0, %v1113_v56  ;;  %v1109_v63 = vor.u32 1.1754944e-38, %v1108_v51  ;;  %v1123_v24 = vand.u32 2147483648, %v1944_v35 }
 0x2f8   : > { %v1382_v0 = vpop.eup %1381  ;;  %v1150_v27 = vadd.f32 1.0, %v1035_v12  ;;  %v1154_v38 = vadd.f32 1.0, %v1095_v42  ;;  %vm1118_vm6 = vweird.f32 %v1380_v36  ;;  %vm2061_vm7 = vcmp.eq.f32.partialorder %v1121_v28, 8.507059e+37 }
 0x2f9   : > { %v1105_v17 = vsel %vm1104_vm0, %v1378_v59, %v1101_v29  ;;  %v1115_v25 = vmul.f32 %v1380_v36, %v1114_v61  ;;  %v1128_v62 = vmul.f32 %v1382_v0, %v1947_v26  ;;  %v1196_v43 = vrot.slane %v1153_v1, 5  ;;  %vm1119_vm3 = vmor %vm1117_vm15, %vm1118_vm6 }
 0x2fa   : > { %v1110_v47 = vsel %vm2049_vm2, %v1109_v63, %v1105_v17  ;;  %v1193_v50 = vsel %vm518_vm8, %v1192_v48, %v1150_v27  ;;  %v1124_v52 = vor.u32 1.1754944e-38, %v1123_v24  ;;  %v1138_v58 = vand.u32 2147483648, %v1947_v26 }
 0x2fb   : > { %v1116_v4 = vadd.f32 %v1380_v36, %v1115_v25  ;;  %v1129_v60 = vsub.f32 1.0, %v1128_v62  ;;  %v1155_v32 = vadd.f32 1.0, %v1110_v47  ;;  %v1195_v5 = vsel %vm521_vm9, %v1194_v39, %v1193_v50 }
 0x2fc   : > { %vm2141_vm12 = vcmask 1043459   ;;  %v1198_v6 = vrot.slane %v1154_v38, 4  ;;  %vm1133_vm1 = vweird.f32 %v1382_v0  ;;  %v1136_v21 = vand.u32 2147483647, %v1947_v26 }
 0x2fd   : > { %v1197_v22 = vsel %vm2141_vm12, %v1196_v43, %v1195_v5  ;;  %v1120_v53 = vsel %vm1119_vm3, %v1380_v36, %v1116_v4  ;;  %v1130_v7 = vmul.f32 %v1382_v0, %v1129_v60  ;;  %vm2142_vm8 = vcmask 1044484  }
 0x2fe   : > { %v1125_v55 = vsel %vm2061_vm7, %v1124_v52, %v1120_v53  ;;  %v1199_v3 = vsel %vm2142_vm8, %v1198_v6, %v1197_v22  ;;  %vm1132_vm9 = vweird.f32 %v1947_v26  ;;  %v1200_v40 = vrot.slane %v1155_v32, 3 }
 0x2ff   : > { %v1131_v57 = vadd.f32 %v1382_v0, %v1130_v7  ;;  %v1156_v35 = vadd.f32 1.0, %v1125_v55  ;;  %vm1134_vm5 = vmor %vm1132_vm9, %vm1133_vm1  ;;  %v1139_v11 = vor.u32 1.1754944e-38, %v1138_v58  ;;  %vm1137_vm11 = vcmp.eq.f32.partialorder %v1136_v21, 8.507059e+37 }
 0x300   : > { %vm2143_vm14 = vcmask 1045509   ;;  %vm2144_vm10 = vcmask 1046534   ;;  %vm2145_vm4 = vcmask 1047559  }
 0x301   : > { %v1135_v9 = vsel %vm1134_vm5, %v1382_v0, %v1131_v57  ;;  %v1201_v8 = vsel %vm2143_vm14, %v1200_v40, %v1199_v3  ;;  %v1202_v16 = vrot.slane %v1156_v35, 2 }
 0x302   : > { %v1140_v15 = vsel %vm1137_vm11, %v1139_v11, %v1135_v9 }
 0x303   : > { %v1157_v10 = vadd.f32 1.0, %v1140_v15  ;;  %v1203_v59 = vsel %vm2144_vm10, %v1202_v16, %v1201_v8 }
 0x305   : > { %v1204_v18 = vrot.slane %v1157_v10, 1 }
 0x307   : > { %v1205_v49 = vsel %vm2145_vm4, %v1204_v18, %v1203_v59 }
 0x308   : > { %v1209_v20 = vmul.f32 %v1384_v19, %v1205_v49 }
 0x30a   : > { %1211 = vst [vmem:[%s1957_s29 + $0x8] sm:$0xff] %v1209_v20 }
 0x30b PF: > { %s15_s18 = sadd.s32 1, %s1391_s18  }
 0x30c   : > { %p12_p4 = scmp.ge.s32.totalorder %s15_s18, 4  }
 0x30e   :  { %14 = sbr.rel (!%p12_p4) target bundleno = 1 (0x1), region = 71 }

</bundles_post_ra>
